<compile_context>
chip_gen: v5e
topology: v5e:2x2
jax: 0.10.0
libtpu: 0.0.40
codegen_flags: <defaults>
</compile_context>

<pallas_src>
import jax
import jax.numpy as jnp
from jax.experimental import pallas as pl
from jax.experimental.pallas import tpu as pltpu
import numpy as np

# ----------------------------- model config ---------------------------------
B = 2          # batch
S = 8          # sequence length
H = 32         # hidden size
NH = 2         # attention heads
HD = H // NH   # head dim
I = 64         # FFN intermediate size
VOCAB = 100
TYPE_VOCAB = 2
NLAYERS = 2
NUM_OUTPUTS = 1
LN_EPS = 1e-12


# ----------------------------- fused Pallas kernel ---------------------------

def _fused_bert_kernel(
    x_ref, addmask_ref,
    emb_g_ref, emb_b_ref,
    wqkv_ref, bqkv_ref, wo_ref, bo_ref,
    ln1_g_ref, ln1_b_ref,
    w1_ref, b1_ref, w2_ref, b2_ref,
    ln2_g_ref, ln2_b_ref,
    pool_w_ref, pool_b_ref, out_wt_ref, out_b_ref,
    o_ref,
    attn_scratch,
):
    def layer_norm(x, g, b):
        mu = jnp.mean(x, axis=-1, keepdims=True)
        xc = x - mu
        var = jnp.mean(xc * xc, axis=-1, keepdims=True)
        return xc * jax.lax.rsqrt(var + LN_EPS) * g + b

    def gelu(x):
        # tanh-approximate GELU (matches the in-file reference)
        c = jnp.float32(0.7978845608028654)  # sqrt(2/pi)
        return 0.5 * x * (1.0 + jnp.tanh(c * (x + 0.044715 * x * x * x)))

    def dot(a, b):
        return jnp.dot(a, b, preferred_element_type=jnp.float32)

    def dot_nt(a, b):  # a @ b.T, contracting last dims (no explicit transpose)
        return jax.lax.dot_general(
            a, b, (((1,), (1,)), ((), ())), preferred_element_type=jnp.float32)

    scale = jnp.float32(1.0 / np.sqrt(HD))
    addmask = addmask_ref[...]                                    # (B, S): 0 / -1e9

    # Embedding LayerNorm (no fake zero residual).
    xf = layer_norm(x_ref[...], emb_g_ref[...], emb_b_ref[...])   # (B*S, H)

    for l in range(NLAYERS):
        # ---- self attention with packed QKV -------------------------------
        qkv = dot(xf, wqkv_ref[l]) + bqkv_ref[l]                  # (B*S, 3H)
        q = qkv[:, 0 * H:1 * H]
        k = qkv[:, 1 * H:2 * H]
        v = qkv[:, 2 * H:3 * H]
        wo = wo_ref[l]                                            # (H, H)

        for b in range(B):
            m_b = addmask[b:b + 1, :]                             # (1, S)
            r0, r1 = b * S, (b + 1) * S
            acc = None
            for h in range(NH):
                c0, c1 = h * HD, (h + 1) * HD
                qh = q[r0:r1, c0:c1]                              # (S, HD)
                kh = k[r0:r1, c0:c1]
                vh = v[r0:r1, c0:c1]
                s = dot_nt(qh, kh) * scale + m_b                  # (S, S)
                s = s - jnp.max(s, axis=-1, keepdims=True)
                p = jnp.exp(s)
                p = p * pl.reciprocal(jnp.sum(p, axis=-1, keepdims=True),
                                      approx=True)
                ctx_h = dot(p, vh)                                # (S, HD)
                # Fold the head-merge into the output projection.
                part = dot(ctx_h, wo[c0:c1, :])                   # (S, H)
                acc = part if acc is None else acc + part
            attn_scratch[r0:r1, :] = acc

        attn_out = attn_scratch[...] + bo_ref[l]                  # (B*S, H)
        x1 = layer_norm(attn_out + xf, ln1_g_ref[l], ln1_b_ref[l])

        # ---- feed forward ---------------------------------------------------
        ff = gelu(dot(x1, w1_ref[l]) + b1_ref[l])                 # (B*S, I)
        ff = dot(ff, w2_ref[l]) + b2_ref[l]                       # (B*S, H)
        xf = layer_norm(ff + x1, ln2_g_ref[l], ln2_b_ref[l])

    # ---- pooler + regression head --------------------------------------------
    # Computed for all rows (trivial at this size); the wrapper keeps only the
    # [CLS] rows, which is mathematically identical to pooling [CLS] first.
    pooled = jnp.tanh(dot(xf, pool_w_ref[...]) + pool_b_ref[...])  # (B*S, H)
    # nn.Dropout(p=0.3): identity at inference.
    logits = (jnp.sum(pooled * out_wt_ref[...], axis=-1, keepdims=True)
              + out_b_ref[...])                                    # (B*S, 1)
    o_ref[...] = logits


# ----------------------------- parameters -----------------------------------

def init_params(key):
    ks = iter(jax.random.split(key, 128))

    def dense(din, dout):
        w = jax.random.normal(next(ks), (din, dout), jnp.float32) * 0.02
        b = jnp.zeros((dout,), jnp.float32)
        return w, b

    p = {
        "word_emb": jax.random.normal(next(ks), (VOCAB, H), jnp.float32) * 0.02,
        "pos_emb": jax.random.normal(next(ks), (S, H), jnp.float32) * 0.02,
        "type_emb": jax.random.normal(next(ks), (TYPE_VOCAB, H), jnp.float32) * 0.02,
        "emb_ln_g": jnp.ones((H,), jnp.float32),
        "emb_ln_b": jnp.zeros((H,), jnp.float32),
        "layers": [],
    }
    for _ in range(NLAYERS):
        lp = {}
        lp["wq"], lp["bq"] = dense(H, H)
        lp["wk"], lp["bk"] = dense(H, H)
        lp["wv"], lp["bv"] = dense(H, H)
        lp["wo"], lp["bo"] = dense(H, H)
        lp["ln1_g"], lp["ln1_b"] = jnp.ones((H,), jnp.float32), jnp.zeros((H,), jnp.float32)
        lp["w1"], lp["b1"] = dense(H, I)
        lp["w2"], lp["b2"] = dense(I, H)
        lp["ln2_g"], lp["ln2_b"] = jnp.ones((H,), jnp.float32), jnp.zeros((H,), jnp.float32)
        p["layers"].append(lp)
    p["pool_w"], p["pool_b"] = dense(H, H)
    p["out_w"], p["out_b"] = dense(H, NUM_OUTPUTS)
    return p


# ----------------------------- forward (single Pallas call) ------------------

def bert_disney_reviews_forward(params, input_ids, attention_mask):
    mask_f = attention_mask.astype(jnp.float32)                   # (B, S)
    add_mask = (1.0 - mask_f) * jnp.float32(-1e9)                 # additive mask

    # Embedding gather / sum is glue; everything else runs inside the kernel.
    x = (jnp.take(params["word_emb"], input_ids, axis=0)
         + params["pos_emb"][None, :, :]
         + params["type_emb"][0][None, None, :]).reshape(B * S, H)

    # Pack per-layer weights into stacked, QKV-fused arrays (one-time glue).
    L = params["layers"]
    wqkv = jnp.stack([jnp.concatenate([lp["wq"], lp["wk"], lp["wv"]], axis=1)
                      for lp in L])                               # (NL, H, 3H)
    bqkv = jnp.stack([jnp.concatenate([lp["bq"], lp["bk"], lp["bv"]])[None, :]
                      for lp in L])                               # (NL, 1, 3H)
    wo = jnp.stack([lp["wo"] for lp in L])                        # (NL, H, H)
    bo = jnp.stack([lp["bo"][None, :] for lp in L])               # (NL, 1, H)
    ln1g = jnp.stack([lp["ln1_g"][None, :] for lp in L])
    ln1b = jnp.stack([lp["ln1_b"][None, :] for lp in L])
    w1 = jnp.stack([lp["w1"] for lp in L])                        # (NL, H, I)
    b1 = jnp.stack([lp["b1"][None, :] for lp in L])
    w2 = jnp.stack([lp["w2"] for lp in L])                        # (NL, I, H)
    b2 = jnp.stack([lp["b2"][None, :] for lp in L])
    ln2g = jnp.stack([lp["ln2_g"][None, :] for lp in L])
    ln2b = jnp.stack([lp["ln2_b"][None, :] for lp in L])

    logits_all = pl.pallas_call(
        _fused_bert_kernel,
        out_shape=jax.ShapeDtypeStruct((B * S, NUM_OUTPUTS), jnp.float32),
        scratch_shapes=[pltpu.VMEM((B * S, H), jnp.float32)],
    )(x, add_mask,
      params["emb_ln_g"][None, :], params["emb_ln_b"][None, :],
      wqkv, bqkv, wo, bo, ln1g, ln1b, w1, b1, w2, b2, ln2g, ln2b,
      params["pool_w"], params["pool_b"][None, :],
      params["out_w"].T, params["out_b"][None, :])

    # Keep only the [CLS] (position 0) row of every sequence.
    return logits_all[0::S, :]                                    # (B, 1)


# ----------------------------- pure-JAX reference ----------------------------

def _ref_forward(params, input_ids, attention_mask):
    def ln(x, g, b):
        mu = jnp.mean(x, axis=-1, keepdims=True)
        var = jnp.mean((x - mu) ** 2, axis=-1, keepdims=True)
        return (x - mu) * jax.lax.rsqrt(var + LN_EPS) * g + b

    def gelu(x):
        c = 0.7978845608028654
        return 0.5 * x * (1.0 + jnp.tanh(c * (x + 0.044715 * x ** 3)))

    mask_f = attention_mask.astype(jnp.float32)
    x = (jnp.take(params["word_emb"], input_ids, axis=0)
         + params["pos_emb"][None] + params["type_emb"][0][None, None])
    x = ln(x, params["emb_ln_g"], params["emb_ln_b"])
    for lp in params["layers"]:
        q = x @ lp["wq"] + lp["bq"]
        k = x @ lp["wk"] + lp["bk"]
        v = x @ lp["wv"] + lp["bv"]
        qh = q.reshape(B, S, NH, HD).transpose(0, 2, 1, 3)
        kh = k.reshape(B, S, NH, HD).transpose(0, 2, 1, 3)
        vh = v.reshape(B, S, NH, HD).transpose(0, 2, 1, 3)
        s = jnp.einsum("bhqd,bhkd->bhqk", qh, kh) / np.sqrt(HD)
        s = s + (1.0 - mask_f)[:, None, None, :] * -1e9
        p = jax.nn.softmax(s, axis=-1)
        ctx = jnp.einsum("bhqk,bhkd->bhqd", p, vh)
        ctx = ctx.transpose(0, 2, 1, 3).reshape(B, S, H)
        x = ln(ctx @ lp["wo"] + lp["bo"] + x, lp["ln1_g"], lp["ln1_b"])
        ff = gelu(x @ lp["w1"] + lp["b1"]) @ lp["w2"] + lp["b2"]
        x = ln(ff + x, lp["ln2_g"], lp["ln2_b"])
    pooled = jnp.tanh(x[:, 0, :] @ params["pool_w"] + params["pool_b"])
    return pooled @ params["out_w"] + params["out_b"]


# ----------------------------- main ------------------------------------------

if __name__ == "__main__":
    key = jax.random.PRNGKey(0)
    kp, ki = jax.random.split(key)
    params = init_params(kp)

    input_ids = jax.random.randint(ki, (B, S), 0, VOCAB, dtype=jnp.int32)
    attention_mask = jnp.ones((B, S), dtype=jnp.int32).at[:, -2:].set(0)

    fwd = jax.jit(bert_disney_reviews_forward)
    out = jax.block_until_ready(fwd(params, input_ids, attention_mask))

    ref = _ref_forward(params, input_ids, attention_mask)
    assert out.shape == (B, NUM_OUTPUTS)
    np.testing.assert_allclose(np.asarray(out), np.asarray(ref), rtol=1e-2, atol=1e-2)

    print("KERNEL_OK")
</pallas_src>

<mosaic_0001>
module attributes {stable_mosaic.version = 11 : i64} {
  func.func @_fused_bert_kernel(%arg0: memref<16x32xf32, #tpu.memory_space<vmem>>, %arg1: memref<2x8xf32, #tpu.memory_space<vmem>>, %arg2: memref<1x32xf32, #tpu.memory_space<vmem>>, %arg3: memref<1x32xf32, #tpu.memory_space<vmem>>, %arg4: memref<2x32x96xf32, #tpu.memory_space<vmem>>, %arg5: memref<2x1x96xf32, #tpu.memory_space<vmem>>, %arg6: memref<2x32x32xf32, #tpu.memory_space<vmem>>, %arg7: memref<2x1x32xf32, #tpu.memory_space<vmem>>, %arg8: memref<2x1x32xf32, #tpu.memory_space<vmem>>, %arg9: memref<2x1x32xf32, #tpu.memory_space<vmem>>, %arg10: memref<2x32x64xf32, #tpu.memory_space<vmem>>, %arg11: memref<2x1x64xf32, #tpu.memory_space<vmem>>, %arg12: memref<2x64x32xf32, #tpu.memory_space<vmem>>, %arg13: memref<2x1x32xf32, #tpu.memory_space<vmem>>, %arg14: memref<2x1x32xf32, #tpu.memory_space<vmem>>, %arg15: memref<2x1x32xf32, #tpu.memory_space<vmem>>, %arg16: memref<32x32xf32, #tpu.memory_space<vmem>>, %arg17: memref<1x32xf32, #tpu.memory_space<vmem>>, %arg18: memref<1x32xf32, #tpu.memory_space<vmem>>, %arg19: memref<1x1xf32, #tpu.memory_space<vmem>>, %arg20: memref<16x1xf32, #tpu.memory_space<vmem>>, %arg21: memref<16x32xf32, #tpu.memory_space<vmem>>) attributes {dimension_semantics = [], scalar_prefetch = 0 : i64, scratch_operands = 1 : i64, tpu.core_type = #tpu.core_type<tc>} {
    %c0 = arith.constant 0 : index
    %c0_0 = arith.constant 0 : index
    %0 = vector.load %arg1[%c0, %c0_0] : memref<2x8xf32, #tpu.memory_space<vmem>>, vector<2x8xf32>
    %c0_1 = arith.constant 0 : index
    %c0_2 = arith.constant 0 : index
    %1 = vector.load %arg0[%c0_1, %c0_2] : memref<16x32xf32, #tpu.memory_space<vmem>>, vector<16x32xf32>
    %c0_3 = arith.constant 0 : index
    %c0_4 = arith.constant 0 : index
    %2 = vector.load %arg2[%c0_3, %c0_4] : memref<1x32xf32, #tpu.memory_space<vmem>>, vector<1x32xf32>
    %c0_5 = arith.constant 0 : index
    %c0_6 = arith.constant 0 : index
    %3 = vector.load %arg3[%c0_5, %c0_6] : memref<1x32xf32, #tpu.memory_space<vmem>>, vector<1x32xf32>
    %cst = arith.constant dense<0.000000e+00> : vector<16xf32>
    %4 = vector.multi_reduction <add>, %1, %cst [1] : vector<16x32xf32> to vector<16xf32>
    %5 = vector.shape_cast %4 : vector<16xf32> to vector<16x1xf32>
    %cst_7 = arith.constant 3.200000e+01 : f32
    %6 = vector.broadcast %cst_7 : f32 to vector<16x1xf32>
    %7 = arith.divf %5, %6 : vector<16x1xf32>
    %8 = vector.broadcast %7 : vector<16x1xf32> to vector<16x32xf32>
    %9 = arith.subf %1, %8 : vector<16x32xf32>
    %10 = arith.mulf %9, %9 : vector<16x32xf32>
    %cst_8 = arith.constant dense<0.000000e+00> : vector<16xf32>
    %11 = vector.multi_reduction <add>, %10, %cst_8 [1] : vector<16x32xf32> to vector<16xf32>
    %12 = vector.shape_cast %11 : vector<16xf32> to vector<16x1xf32>
    %cst_9 = arith.constant 3.200000e+01 : f32
    %13 = vector.broadcast %cst_9 : f32 to vector<16x1xf32>
    %14 = arith.divf %12, %13 : vector<16x1xf32>
    %cst_10 = arith.constant 9.99999996E-13 : f32
    %15 = vector.broadcast %cst_10 : f32 to vector<16x1xf32>
    %16 = arith.addf %14, %15 : vector<16x1xf32>
    %17 = math.rsqrt %16 : vector<16x1xf32>
    %18 = vector.broadcast %17 : vector<16x1xf32> to vector<16x32xf32>
    %19 = arith.mulf %9, %18 : vector<16x32xf32>
    %20 = vector.broadcast %2 : vector<1x32xf32> to vector<16x32xf32>
    %21 = arith.mulf %19, %20 : vector<16x32xf32>
    %22 = vector.broadcast %3 : vector<1x32xf32> to vector<16x32xf32>
    %23 = arith.addf %21, %22 : vector<16x32xf32>
    %c0_11 = arith.constant 0 : index
    %c0_12 = arith.constant 0 : index
    %c0_13 = arith.constant 0 : index
    %24 = vector.load %arg4[%c0_11, %c0_12, %c0_13] : memref<2x32x96xf32, #tpu.memory_space<vmem>>, vector<1x32x96xf32>
    %25 = vector.shape_cast %24 : vector<1x32x96xf32> to vector<32x96xf32>
    %cst_14 = arith.constant dense<0.000000e+00> : vector<16x96xf32>
    %26 = tpu.matmul %23, %25, %cst_14 {dimension_numbers = #tpu.dot_dimension_numbers<[1], [0], [0], [1], [0, 0, 1, 1], [], []>} : vector<16x32xf32>, vector<32x96xf32>, vector<16x96xf32> -> vector<16x96xf32>
    %c0_15 = arith.constant 0 : index
    %c0_16 = arith.constant 0 : index
    %c0_17 = arith.constant 0 : index
    %27 = vector.load %arg5[%c0_15, %c0_16, %c0_17] : memref<2x1x96xf32, #tpu.memory_space<vmem>>, vector<1x1x96xf32>
    %28 = vector.shape_cast %27 : vector<1x1x96xf32> to vector<1x96xf32>
    %29 = vector.broadcast %28 : vector<1x96xf32> to vector<16x96xf32>
    %30 = arith.addf %26, %29 : vector<16x96xf32>
    %31 = vector.extract_strided_slice %30 {offsets = [0, 0], sizes = [16, 32], strides = [1, 1]} : vector<16x96xf32> to vector<16x32xf32>
    %32 = vector.extract_strided_slice %30 {offsets = [0, 32], sizes = [16, 32], strides = [1, 1]} : vector<16x96xf32> to vector<16x32xf32>
    %33 = vector.extract_strided_slice %30 {offsets = [0, 64], sizes = [16, 32], strides = [1, 1]} : vector<16x96xf32> to vector<16x32xf32>
    %c0_18 = arith.constant 0 : index
    %c0_19 = arith.constant 0 : index
    %c0_20 = arith.constant 0 : index
    %34 = vector.load %arg6[%c0_18, %c0_19, %c0_20] : memref<2x32x32xf32, #tpu.memory_space<vmem>>, vector<1x32x32xf32>
    %35 = vector.shape_cast %34 : vector<1x32x32xf32> to vector<32x32xf32>
    %36 = vector.extract_strided_slice %0 {offsets = [0, 0], sizes = [1, 8], strides = [1, 1]} : vector<2x8xf32> to vector<1x8xf32>
    %37 = vector.extract_strided_slice %31 {offsets = [0, 0], sizes = [8, 16], strides = [1, 1]} : vector<16x32xf32> to vector<8x16xf32>
    %38 = vector.extract_strided_slice %32 {offsets = [0, 0], sizes = [8, 16], strides = [1, 1]} : vector<16x32xf32> to vector<8x16xf32>
    %39 = vector.extract_strided_slice %33 {offsets = [0, 0], sizes = [8, 16], strides = [1, 1]} : vector<16x32xf32> to vector<8x16xf32>
    %cst_21 = arith.constant dense<0.000000e+00> : vector<8x8xf32>
    %40 = tpu.matmul %37, %38, %cst_21 {dimension_numbers = #tpu.dot_dimension_numbers<[1], [1], [0], [0], [0, 0, 1, 0], [], []>} : vector<8x16xf32>, vector<8x16xf32>, vector<8x8xf32> -> vector<8x8xf32>
    %cst_22 = arith.constant 2.500000e-01 : f32
    %41 = vector.broadcast %cst_22 : f32 to vector<8x8xf32>
    %42 = arith.mulf %40, %41 : vector<8x8xf32>
    %43 = vector.broadcast %36 : vector<1x8xf32> to vector<8x8xf32>
    %44 = arith.addf %42, %43 : vector<8x8xf32>
    %cst_23 = arith.constant dense<0xFF800000> : vector<8xf32>
    %45 = vector.multi_reduction <maximumf>, %44, %cst_23 [1] : vector<8x8xf32> to vector<8xf32>
    %46 = vector.shape_cast %45 : vector<8xf32> to vector<8x1xf32>
    %47 = vector.broadcast %46 : vector<8x1xf32> to vector<8x8xf32>
    %48 = arith.subf %44, %47 : vector<8x8xf32>
    %49 = math.exp %48 : vector<8x8xf32>
    %cst_24 = arith.constant dense<0.000000e+00> : vector<8xf32>
    %50 = vector.multi_reduction <add>, %49, %cst_24 [1] : vector<8x8xf32> to vector<8xf32>
    %51 = vector.shape_cast %50 : vector<8xf32> to vector<8x1xf32>
    %52 = tpu.reciprocal %51 {approx = true} : vector<8x1xf32> -> vector<8x1xf32>
    %53 = vector.broadcast %52 : vector<8x1xf32> to vector<8x8xf32>
    %54 = arith.mulf %49, %53 : vector<8x8xf32>
    %cst_25 = arith.constant dense<0.000000e+00> : vector<8x16xf32>
    %55 = tpu.matmul %54, %39, %cst_25 {dimension_numbers = #tpu.dot_dimension_numbers<[1], [0], [0], [1], [0, 0, 1, 1], [], []>} : vector<8x8xf32>, vector<8x16xf32>, vector<8x16xf32> -> vector<8x16xf32>
    %56 = vector.extract_strided_slice %35 {offsets = [0, 0], sizes = [16, 32], strides = [1, 1]} : vector<32x32xf32> to vector<16x32xf32>
    %cst_26 = arith.constant dense<0.000000e+00> : vector<8x32xf32>
    %57 = tpu.matmul %55, %56, %cst_26 {dimension_numbers = #tpu.dot_dimension_numbers<[1], [0], [0], [1], [0, 0, 1, 1], [], []>} : vector<8x16xf32>, vector<16x32xf32>, vector<8x32xf32> -> vector<8x32xf32>
    %58 = vector.extract_strided_slice %31 {offsets = [0, 16], sizes = [8, 16], strides = [1, 1]} : vector<16x32xf32> to vector<8x16xf32>
    %59 = vector.extract_strided_slice %32 {offsets = [0, 16], sizes = [8, 16], strides = [1, 1]} : vector<16x32xf32> to vector<8x16xf32>
    %60 = vector.extract_strided_slice %33 {offsets = [0, 16], sizes = [8, 16], strides = [1, 1]} : vector<16x32xf32> to vector<8x16xf32>
    %cst_27 = arith.constant dense<0.000000e+00> : vector<8x8xf32>
    %61 = tpu.matmul %58, %59, %cst_27 {dimension_numbers = #tpu.dot_dimension_numbers<[1], [1], [0], [0], [0, 0, 1, 0], [], []>} : vector<8x16xf32>, vector<8x16xf32>, vector<8x8xf32> -> vector<8x8xf32>
    %cst_28 = arith.constant 2.500000e-01 : f32
    %62 = vector.broadcast %cst_28 : f32 to vector<8x8xf32>
    %63 = arith.mulf %61, %62 : vector<8x8xf32>
    %64 = vector.broadcast %36 : vector<1x8xf32> to vector<8x8xf32>
    %65 = arith.addf %63, %64 : vector<8x8xf32>
    %cst_29 = arith.constant dense<0xFF800000> : vector<8xf32>
    %66 = vector.multi_reduction <maximumf>, %65, %cst_29 [1] : vector<8x8xf32> to vector<8xf32>
    %67 = vector.shape_cast %66 : vector<8xf32> to vector<8x1xf32>
    %68 = vector.broadcast %67 : vector<8x1xf32> to vector<8x8xf32>
    %69 = arith.subf %65, %68 : vector<8x8xf32>
    %70 = math.exp %69 : vector<8x8xf32>
    %cst_30 = arith.constant dense<0.000000e+00> : vector<8xf32>
    %71 = vector.multi_reduction <add>, %70, %cst_30 [1] : vector<8x8xf32> to vector<8xf32>
    %72 = vector.shape_cast %71 : vector<8xf32> to vector<8x1xf32>
    %73 = tpu.reciprocal %72 {approx = true} : vector<8x1xf32> -> vector<8x1xf32>
    %74 = vector.broadcast %73 : vector<8x1xf32> to vector<8x8xf32>
    %75 = arith.mulf %70, %74 : vector<8x8xf32>
    %cst_31 = arith.constant dense<0.000000e+00> : vector<8x16xf32>
    %76 = tpu.matmul %75, %60, %cst_31 {dimension_numbers = #tpu.dot_dimension_numbers<[1], [0], [0], [1], [0, 0, 1, 1], [], []>} : vector<8x8xf32>, vector<8x16xf32>, vector<8x16xf32> -> vector<8x16xf32>
    %77 = vector.extract_strided_slice %35 {offsets = [16, 0], sizes = [16, 32], strides = [1, 1]} : vector<32x32xf32> to vector<16x32xf32>
    %cst_32 = arith.constant dense<0.000000e+00> : vector<8x32xf32>
    %78 = tpu.matmul %76, %77, %cst_32 {dimension_numbers = #tpu.dot_dimension_numbers<[1], [0], [0], [1], [0, 0, 1, 1], [], []>} : vector<8x16xf32>, vector<16x32xf32>, vector<8x32xf32> -> vector<8x32xf32>
    %79 = arith.addf %57, %78 : vector<8x32xf32>
    %c0_33 = arith.constant 0 : index
    %c0_34 = arith.constant 0 : index
    %80 = vector.load %arg21[%c0_33, %c0_34] : memref<16x32xf32, #tpu.memory_space<vmem>>, vector<8x32xf32>
    tpu.vector_store %arg21[%c0_33, %c0_34], %79 {strides = array<i32>} : memref<16x32xf32, #tpu.memory_space<vmem>>, vector<8x32xf32>,
    %81 = vector.extract_strided_slice %0 {offsets = [1, 0], sizes = [1, 8], strides = [1, 1]} : vector<2x8xf32> to vector<1x8xf32>
    %82 = vector.extract_strided_slice %31 {offsets = [8, 0], sizes = [8, 16], strides = [1, 1]} : vector<16x32xf32> to vector<8x16xf32>
    %83 = vector.extract_strided_slice %32 {offsets = [8, 0], sizes = [8, 16], strides = [1, 1]} : vector<16x32xf32> to vector<8x16xf32>
    %84 = vector.extract_strided_slice %33 {offsets = [8, 0], sizes = [8, 16], strides = [1, 1]} : vector<16x32xf32> to vector<8x16xf32>
    %cst_35 = arith.constant dense<0.000000e+00> : vector<8x8xf32>
    %85 = tpu.matmul %82, %83, %cst_35 {dimension_numbers = #tpu.dot_dimension_numbers<[1], [1], [0], [0], [0, 0, 1, 0], [], []>} : vector<8x16xf32>, vector<8x16xf32>, vector<8x8xf32> -> vector<8x8xf32>
    %cst_36 = arith.constant 2.500000e-01 : f32
    %86 = vector.broadcast %cst_36 : f32 to vector<8x8xf32>
    %87 = arith.mulf %85, %86 : vector<8x8xf32>
    %88 = vector.broadcast %81 : vector<1x8xf32> to vector<8x8xf32>
    %89 = arith.addf %87, %88 : vector<8x8xf32>
    %cst_37 = arith.constant dense<0xFF800000> : vector<8xf32>
    %90 = vector.multi_reduction <maximumf>, %89, %cst_37 [1] : vector<8x8xf32> to vector<8xf32>
    %91 = vector.shape_cast %90 : vector<8xf32> to vector<8x1xf32>
    %92 = vector.broadcast %91 : vector<8x1xf32> to vector<8x8xf32>
    %93 = arith.subf %89, %92 : vector<8x8xf32>
    %94 = math.exp %93 : vector<8x8xf32>
    %cst_38 = arith.constant dense<0.000000e+00> : vector<8xf32>
    %95 = vector.multi_reduction <add>, %94, %cst_38 [1] : vector<8x8xf32> to vector<8xf32>
    %96 = vector.shape_cast %95 : vector<8xf32> to vector<8x1xf32>
    %97 = tpu.reciprocal %96 {approx = true} : vector<8x1xf32> -> vector<8x1xf32>
    %98 = vector.broadcast %97 : vector<8x1xf32> to vector<8x8xf32>
    %99 = arith.mulf %94, %98 : vector<8x8xf32>
    %cst_39 = arith.constant dense<0.000000e+00> : vector<8x16xf32>
    %100 = tpu.matmul %99, %84, %cst_39 {dimension_numbers = #tpu.dot_dimension_numbers<[1], [0], [0], [1], [0, 0, 1, 1], [], []>} : vector<8x8xf32>, vector<8x16xf32>, vector<8x16xf32> -> vector<8x16xf32>
    %101 = vector.extract_strided_slice %35 {offsets = [0, 0], sizes = [16, 32], strides = [1, 1]} : vector<32x32xf32> to vector<16x32xf32>
    %cst_40 = arith.constant dense<0.000000e+00> : vector<8x32xf32>
    %102 = tpu.matmul %100, %101, %cst_40 {dimension_numbers = #tpu.dot_dimension_numbers<[1], [0], [0], [1], [0, 0, 1, 1], [], []>} : vector<8x16xf32>, vector<16x32xf32>, vector<8x32xf32> -> vector<8x32xf32>
    %103 = vector.extract_strided_slice %31 {offsets = [8, 16], sizes = [8, 16], strides = [1, 1]} : vector<16x32xf32> to vector<8x16xf32>
    %104 = vector.extract_strided_slice %32 {offsets = [8, 16], sizes = [8, 16], strides = [1, 1]} : vector<16x32xf32> to vector<8x16xf32>
    %105 = vector.extract_strided_slice %33 {offsets = [8, 16], sizes = [8, 16], strides = [1, 1]} : vector<16x32xf32> to vector<8x16xf32>
    %cst_41 = arith.constant dense<0.000000e+00> : vector<8x8xf32>
    %106 = tpu.matmul %103, %104, %cst_41 {dimension_numbers = #tpu.dot_dimension_numbers<[1], [1], [0], [0], [0, 0, 1, 0], [], []>} : vector<8x16xf32>, vector<8x16xf32>, vector<8x8xf32> -> vector<8x8xf32>
    %cst_42 = arith.constant 2.500000e-01 : f32
    %107 = vector.broadcast %cst_42 : f32 to vector<8x8xf32>
    %108 = arith.mulf %106, %107 : vector<8x8xf32>
    %109 = vector.broadcast %81 : vector<1x8xf32> to vector<8x8xf32>
    %110 = arith.addf %108, %109 : vector<8x8xf32>
    %cst_43 = arith.constant dense<0xFF800000> : vector<8xf32>
    %111 = vector.multi_reduction <maximumf>, %110, %cst_43 [1] : vector<8x8xf32> to vector<8xf32>
    %112 = vector.shape_cast %111 : vector<8xf32> to vector<8x1xf32>
    %113 = vector.broadcast %112 : vector<8x1xf32> to vector<8x8xf32>
    %114 = arith.subf %110, %113 : vector<8x8xf32>
    %115 = math.exp %114 : vector<8x8xf32>
    %cst_44 = arith.constant dense<0.000000e+00> : vector<8xf32>
    %116 = vector.multi_reduction <add>, %115, %cst_44 [1] : vector<8x8xf32> to vector<8xf32>
    %117 = vector.shape_cast %116 : vector<8xf32> to vector<8x1xf32>
    %118 = tpu.reciprocal %117 {approx = true} : vector<8x1xf32> -> vector<8x1xf32>
    %119 = vector.broadcast %118 : vector<8x1xf32> to vector<8x8xf32>
    %120 = arith.mulf %115, %119 : vector<8x8xf32>
    %cst_45 = arith.constant dense<0.000000e+00> : vector<8x16xf32>
    %121 = tpu.matmul %120, %105, %cst_45 {dimension_numbers = #tpu.dot_dimension_numbers<[1], [0], [0], [1], [0, 0, 1, 1], [], []>} : vector<8x8xf32>, vector<8x16xf32>, vector<8x16xf32> -> vector<8x16xf32>
    %122 = vector.extract_strided_slice %35 {offsets = [16, 0], sizes = [16, 32], strides = [1, 1]} : vector<32x32xf32> to vector<16x32xf32>
    %cst_46 = arith.constant dense<0.000000e+00> : vector<8x32xf32>
    %123 = tpu.matmul %121, %122, %cst_46 {dimension_numbers = #tpu.dot_dimension_numbers<[1], [0], [0], [1], [0, 0, 1, 1], [], []>} : vector<8x16xf32>, vector<16x32xf32>, vector<8x32xf32> -> vector<8x32xf32>
    %124 = arith.addf %102, %123 : vector<8x32xf32>
    %c8 = arith.constant 8 : index
    %c0_47 = arith.constant 0 : index
    %125 = vector.load %arg21[%c8, %c0_47] : memref<16x32xf32, #tpu.memory_space<vmem>>, vector<8x32xf32>
    tpu.vector_store %arg21[%c8, %c0_47], %124 {strides = array<i32>} : memref<16x32xf32, #tpu.memory_space<vmem>>, vector<8x32xf32>,
    %c0_48 = arith.constant 0 : index
    %c0_49 = arith.constant 0 : index
    %126 = vector.load %arg21[%c0_48, %c0_49] : memref<16x32xf32, #tpu.memory_space<vmem>>, vector<16x32xf32>
    %c0_50 = arith.constant 0 : index
    %c0_51 = arith.constant 0 : index
    %c0_52 = arith.constant 0 : index
    %127 = vector.load %arg7[%c0_50, %c0_51, %c0_52] : memref<2x1x32xf32, #tpu.memory_space<vmem>>, vector<1x1x32xf32>
    %128 = vector.shape_cast %127 : vector<1x1x32xf32> to vector<1x32xf32>
    %129 = vector.broadcast %128 : vector<1x32xf32> to vector<16x32xf32>
    %130 = arith.addf %126, %129 : vector<16x32xf32>
    %131 = arith.addf %130, %23 : vector<16x32xf32>
    %c0_53 = arith.constant 0 : index
    %c0_54 = arith.constant 0 : index
    %c0_55 = arith.constant 0 : index
    %132 = vector.load %arg8[%c0_53, %c0_54, %c0_55] : memref<2x1x32xf32, #tpu.memory_space<vmem>>, vector<1x1x32xf32>
    %133 = vector.shape_cast %132 : vector<1x1x32xf32> to vector<1x32xf32>
    %c0_56 = arith.constant 0 : index
    %c0_57 = arith.constant 0 : index
    %c0_58 = arith.constant 0 : index
    %134 = vector.load %arg9[%c0_56, %c0_57, %c0_58] : memref<2x1x32xf32, #tpu.memory_space<vmem>>, vector<1x1x32xf32>
    %135 = vector.shape_cast %134 : vector<1x1x32xf32> to vector<1x32xf32>
    %cst_59 = arith.constant dense<0.000000e+00> : vector<16xf32>
    %136 = vector.multi_reduction <add>, %131, %cst_59 [1] : vector<16x32xf32> to vector<16xf32>
    %137 = vector.shape_cast %136 : vector<16xf32> to vector<16x1xf32>
    %cst_60 = arith.constant 3.200000e+01 : f32
    %138 = vector.broadcast %cst_60 : f32 to vector<16x1xf32>
    %139 = arith.divf %137, %138 : vector<16x1xf32>
    %140 = vector.broadcast %139 : vector<16x1xf32> to vector<16x32xf32>
    %141 = arith.subf %131, %140 : vector<16x32xf32>
    %142 = arith.mulf %141, %141 : vector<16x32xf32>
    %cst_61 = arith.constant dense<0.000000e+00> : vector<16xf32>
    %143 = vector.multi_reduction <add>, %142, %cst_61 [1] : vector<16x32xf32> to vector<16xf32>
    %144 = vector.shape_cast %143 : vector<16xf32> to vector<16x1xf32>
    %cst_62 = arith.constant 3.200000e+01 : f32
    %145 = vector.broadcast %cst_62 : f32 to vector<16x1xf32>
    %146 = arith.divf %144, %145 : vector<16x1xf32>
    %cst_63 = arith.constant 9.99999996E-13 : f32
    %147 = vector.broadcast %cst_63 : f32 to vector<16x1xf32>
    %148 = arith.addf %146, %147 : vector<16x1xf32>
    %149 = math.rsqrt %148 : vector<16x1xf32>
    %150 = vector.broadcast %149 : vector<16x1xf32> to vector<16x32xf32>
    %151 = arith.mulf %141, %150 : vector<16x32xf32>
    %152 = vector.broadcast %133 : vector<1x32xf32> to vector<16x32xf32>
    %153 = arith.mulf %151, %152 : vector<16x32xf32>
    %154 = vector.broadcast %135 : vector<1x32xf32> to vector<16x32xf32>
    %155 = arith.addf %153, %154 : vector<16x32xf32>
    %c0_64 = arith.constant 0 : index
    %c0_65 = arith.constant 0 : index
    %c0_66 = arith.constant 0 : index
    %156 = vector.load %arg10[%c0_64, %c0_65, %c0_66] : memref<2x32x64xf32, #tpu.memory_space<vmem>>, vector<1x32x64xf32>
    %157 = vector.shape_cast %156 : vector<1x32x64xf32> to vector<32x64xf32>
    %cst_67 = arith.constant dense<0.000000e+00> : vector<16x64xf32>
    %158 = tpu.matmul %155, %157, %cst_67 {dimension_numbers = #tpu.dot_dimension_numbers<[1], [0], [0], [1], [0, 0, 1, 1], [], []>} : vector<16x32xf32>, vector<32x64xf32>, vector<16x64xf32> -> vector<16x64xf32>
    %c0_68 = arith.constant 0 : index
    %c0_69 = arith.constant 0 : index
    %c0_70 = arith.constant 0 : index
    %159 = vector.load %arg11[%c0_68, %c0_69, %c0_70] : memref<2x1x64xf32, #tpu.memory_space<vmem>>, vector<1x1x64xf32>
    %160 = vector.shape_cast %159 : vector<1x1x64xf32> to vector<1x64xf32>
    %161 = vector.broadcast %160 : vector<1x64xf32> to vector<16x64xf32>
    %162 = arith.addf %158, %161 : vector<16x64xf32>
    %cst_71 = arith.constant 5.000000e-01 : f32
    %163 = vector.broadcast %cst_71 : f32 to vector<16x64xf32>
    %164 = arith.mulf %163, %162 : vector<16x64xf32>
    %cst_72 = arith.constant 4.471500e-02 : f32
    %165 = vector.broadcast %cst_72 : f32 to vector<16x64xf32>
    %166 = arith.mulf %165, %162 : vector<16x64xf32>
    %167 = arith.mulf %166, %162 : vector<16x64xf32>
    %168 = arith.mulf %167, %162 : vector<16x64xf32>
    %169 = arith.addf %162, %168 : vector<16x64xf32>
    %cst_73 = arith.constant 0.797884583 : f32
    %170 = vector.broadcast %cst_73 : f32 to vector<16x64xf32>
    %171 = arith.mulf %170, %169 : vector<16x64xf32>
    %172 = math.tanh %171 : vector<16x64xf32>
    %cst_74 = arith.constant 1.000000e+00 : f32
    %173 = vector.broadcast %cst_74 : f32 to vector<16x64xf32>
    %174 = arith.addf %173, %172 : vector<16x64xf32>
    %175 = arith.mulf %164, %174 : vector<16x64xf32>
    %c0_75 = arith.constant 0 : index
    %c0_76 = arith.constant 0 : index
    %c0_77 = arith.constant 0 : index
    %176 = vector.load %arg12[%c0_75, %c0_76, %c0_77] : memref<2x64x32xf32, #tpu.memory_space<vmem>>, vector<1x64x32xf32>
    %177 = vector.shape_cast %176 : vector<1x64x32xf32> to vector<64x32xf32>
    %cst_78 = arith.constant dense<0.000000e+00> : vector<16x32xf32>
    %178 = tpu.matmul %175, %177, %cst_78 {dimension_numbers = #tpu.dot_dimension_numbers<[1], [0], [0], [1], [0, 0, 1, 1], [], []>} : vector<16x64xf32>, vector<64x32xf32>, vector<16x32xf32> -> vector<16x32xf32>
    %c0_79 = arith.constant 0 : index
    %c0_80 = arith.constant 0 : index
    %c0_81 = arith.constant 0 : index
    %179 = vector.load %arg13[%c0_79, %c0_80, %c0_81] : memref<2x1x32xf32, #tpu.memory_space<vmem>>, vector<1x1x32xf32>
    %180 = vector.shape_cast %179 : vector<1x1x32xf32> to vector<1x32xf32>
    %181 = vector.broadcast %180 : vector<1x32xf32> to vector<16x32xf32>
    %182 = arith.addf %178, %181 : vector<16x32xf32>
    %183 = arith.addf %182, %155 : vector<16x32xf32>
    %c0_82 = arith.constant 0 : index
    %c0_83 = arith.constant 0 : index
    %c0_84 = arith.constant 0 : index
    %184 = vector.load %arg14[%c0_82, %c0_83, %c0_84] : memref<2x1x32xf32, #tpu.memory_space<vmem>>, vector<1x1x32xf32>
    %185 = vector.shape_cast %184 : vector<1x1x32xf32> to vector<1x32xf32>
    %c0_85 = arith.constant 0 : index
    %c0_86 = arith.constant 0 : index
    %c0_87 = arith.constant 0 : index
    %186 = vector.load %arg15[%c0_85, %c0_86, %c0_87] : memref<2x1x32xf32, #tpu.memory_space<vmem>>, vector<1x1x32xf32>
    %187 = vector.shape_cast %186 : vector<1x1x32xf32> to vector<1x32xf32>
    %cst_88 = arith.constant dense<0.000000e+00> : vector<16xf32>
    %188 = vector.multi_reduction <add>, %183, %cst_88 [1] : vector<16x32xf32> to vector<16xf32>
    %189 = vector.shape_cast %188 : vector<16xf32> to vector<16x1xf32>
    %cst_89 = arith.constant 3.200000e+01 : f32
    %190 = vector.broadcast %cst_89 : f32 to vector<16x1xf32>
    %191 = arith.divf %189, %190 : vector<16x1xf32>
    %192 = vector.broadcast %191 : vector<16x1xf32> to vector<16x32xf32>
    %193 = arith.subf %183, %192 : vector<16x32xf32>
    %194 = arith.mulf %193, %193 : vector<16x32xf32>
    %cst_90 = arith.constant dense<0.000000e+00> : vector<16xf32>
    %195 = vector.multi_reduction <add>, %194, %cst_90 [1] : vector<16x32xf32> to vector<16xf32>
    %196 = vector.shape_cast %195 : vector<16xf32> to vector<16x1xf32>
    %cst_91 = arith.constant 3.200000e+01 : f32
    %197 = vector.broadcast %cst_91 : f32 to vector<16x1xf32>
    %198 = arith.divf %196, %197 : vector<16x1xf32>
    %cst_92 = arith.constant 9.99999996E-13 : f32
    %199 = vector.broadcast %cst_92 : f32 to vector<16x1xf32>
    %200 = arith.addf %198, %199 : vector<16x1xf32>
    %201 = math.rsqrt %200 : vector<16x1xf32>
    %202 = vector.broadcast %201 : vector<16x1xf32> to vector<16x32xf32>
    %203 = arith.mulf %193, %202 : vector<16x32xf32>
    %204 = vector.broadcast %185 : vector<1x32xf32> to vector<16x32xf32>
    %205 = arith.mulf %203, %204 : vector<16x32xf32>
    %206 = vector.broadcast %187 : vector<1x32xf32> to vector<16x32xf32>
    %207 = arith.addf %205, %206 : vector<16x32xf32>
    %c1 = arith.constant 1 : index
    %c0_93 = arith.constant 0 : index
    %c0_94 = arith.constant 0 : index
    %208 = vector.load %arg4[%c1, %c0_93, %c0_94] : memref<2x32x96xf32, #tpu.memory_space<vmem>>, vector<1x32x96xf32>
    %209 = vector.shape_cast %208 : vector<1x32x96xf32> to vector<32x96xf32>
    %cst_95 = arith.constant dense<0.000000e+00> : vector<16x96xf32>
    %210 = tpu.matmul %207, %209, %cst_95 {dimension_numbers = #tpu.dot_dimension_numbers<[1], [0], [0], [1], [0, 0, 1, 1], [], []>} : vector<16x32xf32>, vector<32x96xf32>, vector<16x96xf32> -> vector<16x96xf32>
    %c1_96 = arith.constant 1 : index
    %c0_97 = arith.constant 0 : index
    %c0_98 = arith.constant 0 : index
    %211 = vector.load %arg5[%c1_96, %c0_97, %c0_98] : memref<2x1x96xf32, #tpu.memory_space<vmem>>, vector<1x1x96xf32>
    %212 = vector.shape_cast %211 : vector<1x1x96xf32> to vector<1x96xf32>
    %213 = vector.broadcast %212 : vector<1x96xf32> to vector<16x96xf32>
    %214 = arith.addf %210, %213 : vector<16x96xf32>
    %215 = vector.extract_strided_slice %214 {offsets = [0, 0], sizes = [16, 32], strides = [1, 1]} : vector<16x96xf32> to vector<16x32xf32>
    %216 = vector.extract_strided_slice %214 {offsets = [0, 32], sizes = [16, 32], strides = [1, 1]} : vector<16x96xf32> to vector<16x32xf32>
    %217 = vector.extract_strided_slice %214 {offsets = [0, 64], sizes = [16, 32], strides = [1, 1]} : vector<16x96xf32> to vector<16x32xf32>
    %c1_99 = arith.constant 1 : index
    %c0_100 = arith.constant 0 : index
    %c0_101 = arith.constant 0 : index
    %218 = vector.load %arg6[%c1_99, %c0_100, %c0_101] : memref<2x32x32xf32, #tpu.memory_space<vmem>>, vector<1x32x32xf32>
    %219 = vector.shape_cast %218 : vector<1x32x32xf32> to vector<32x32xf32>
    %220 = vector.extract_strided_slice %0 {offsets = [0, 0], sizes = [1, 8], strides = [1, 1]} : vector<2x8xf32> to vector<1x8xf32>
    %221 = vector.extract_strided_slice %215 {offsets = [0, 0], sizes = [8, 16], strides = [1, 1]} : vector<16x32xf32> to vector<8x16xf32>
    %222 = vector.extract_strided_slice %216 {offsets = [0, 0], sizes = [8, 16], strides = [1, 1]} : vector<16x32xf32> to vector<8x16xf32>
    %223 = vector.extract_strided_slice %217 {offsets = [0, 0], sizes = [8, 16], strides = [1, 1]} : vector<16x32xf32> to vector<8x16xf32>
    %cst_102 = arith.constant dense<0.000000e+00> : vector<8x8xf32>
    %224 = tpu.matmul %221, %222, %cst_102 {dimension_numbers = #tpu.dot_dimension_numbers<[1], [1], [0], [0], [0, 0, 1, 0], [], []>} : vector<8x16xf32>, vector<8x16xf32>, vector<8x8xf32> -> vector<8x8xf32>
    %cst_103 = arith.constant 2.500000e-01 : f32
    %225 = vector.broadcast %cst_103 : f32 to vector<8x8xf32>
    %226 = arith.mulf %224, %225 : vector<8x8xf32>
    %227 = vector.broadcast %220 : vector<1x8xf32> to vector<8x8xf32>
    %228 = arith.addf %226, %227 : vector<8x8xf32>
    %cst_104 = arith.constant dense<0xFF800000> : vector<8xf32>
    %229 = vector.multi_reduction <maximumf>, %228, %cst_104 [1] : vector<8x8xf32> to vector<8xf32>
    %230 = vector.shape_cast %229 : vector<8xf32> to vector<8x1xf32>
    %231 = vector.broadcast %230 : vector<8x1xf32> to vector<8x8xf32>
    %232 = arith.subf %228, %231 : vector<8x8xf32>
    %233 = math.exp %232 : vector<8x8xf32>
    %cst_105 = arith.constant dense<0.000000e+00> : vector<8xf32>
    %234 = vector.multi_reduction <add>, %233, %cst_105 [1] : vector<8x8xf32> to vector<8xf32>
    %235 = vector.shape_cast %234 : vector<8xf32> to vector<8x1xf32>
    %236 = tpu.reciprocal %235 {approx = true} : vector<8x1xf32> -> vector<8x1xf32>
    %237 = vector.broadcast %236 : vector<8x1xf32> to vector<8x8xf32>
    %238 = arith.mulf %233, %237 : vector<8x8xf32>
    %cst_106 = arith.constant dense<0.000000e+00> : vector<8x16xf32>
    %239 = tpu.matmul %238, %223, %cst_106 {dimension_numbers = #tpu.dot_dimension_numbers<[1], [0], [0], [1], [0, 0, 1, 1], [], []>} : vector<8x8xf32>, vector<8x16xf32>, vector<8x16xf32> -> vector<8x16xf32>
    %240 = vector.extract_strided_slice %219 {offsets = [0, 0], sizes = [16, 32], strides = [1, 1]} : vector<32x32xf32> to vector<16x32xf32>
    %cst_107 = arith.constant dense<0.000000e+00> : vector<8x32xf32>
    %241 = tpu.matmul %239, %240, %cst_107 {dimension_numbers = #tpu.dot_dimension_numbers<[1], [0], [0], [1], [0, 0, 1, 1], [], []>} : vector<8x16xf32>, vector<16x32xf32>, vector<8x32xf32> -> vector<8x32xf32>
    %242 = vector.extract_strided_slice %215 {offsets = [0, 16], sizes = [8, 16], strides = [1, 1]} : vector<16x32xf32> to vector<8x16xf32>
    %243 = vector.extract_strided_slice %216 {offsets = [0, 16], sizes = [8, 16], strides = [1, 1]} : vector<16x32xf32> to vector<8x16xf32>
    %244 = vector.extract_strided_slice %217 {offsets = [0, 16], sizes = [8, 16], strides = [1, 1]} : vector<16x32xf32> to vector<8x16xf32>
    %cst_108 = arith.constant dense<0.000000e+00> : vector<8x8xf32>
    %245 = tpu.matmul %242, %243, %cst_108 {dimension_numbers = #tpu.dot_dimension_numbers<[1], [1], [0], [0], [0, 0, 1, 0], [], []>} : vector<8x16xf32>, vector<8x16xf32>, vector<8x8xf32> -> vector<8x8xf32>
    %cst_109 = arith.constant 2.500000e-01 : f32
    %246 = vector.broadcast %cst_109 : f32 to vector<8x8xf32>
    %247 = arith.mulf %245, %246 : vector<8x8xf32>
    %248 = vector.broadcast %220 : vector<1x8xf32> to vector<8x8xf32>
    %249 = arith.addf %247, %248 : vector<8x8xf32>
    %cst_110 = arith.constant dense<0xFF800000> : vector<8xf32>
    %250 = vector.multi_reduction <maximumf>, %249, %cst_110 [1] : vector<8x8xf32> to vector<8xf32>
    %251 = vector.shape_cast %250 : vector<8xf32> to vector<8x1xf32>
    %252 = vector.broadcast %251 : vector<8x1xf32> to vector<8x8xf32>
    %253 = arith.subf %249, %252 : vector<8x8xf32>
    %254 = math.exp %253 : vector<8x8xf32>
    %cst_111 = arith.constant dense<0.000000e+00> : vector<8xf32>
    %255 = vector.multi_reduction <add>, %254, %cst_111 [1] : vector<8x8xf32> to vector<8xf32>
    %256 = vector.shape_cast %255 : vector<8xf32> to vector<8x1xf32>
    %257 = tpu.reciprocal %256 {approx = true} : vector<8x1xf32> -> vector<8x1xf32>
    %258 = vector.broadcast %257 : vector<8x1xf32> to vector<8x8xf32>
    %259 = arith.mulf %254, %258 : vector<8x8xf32>
    %cst_112 = arith.constant dense<0.000000e+00> : vector<8x16xf32>
    %260 = tpu.matmul %259, %244, %cst_112 {dimension_numbers = #tpu.dot_dimension_numbers<[1], [0], [0], [1], [0, 0, 1, 1], [], []>} : vector<8x8xf32>, vector<8x16xf32>, vector<8x16xf32> -> vector<8x16xf32>
    %261 = vector.extract_strided_slice %219 {offsets = [16, 0], sizes = [16, 32], strides = [1, 1]} : vector<32x32xf32> to vector<16x32xf32>
    %cst_113 = arith.constant dense<0.000000e+00> : vector<8x32xf32>
    %262 = tpu.matmul %260, %261, %cst_113 {dimension_numbers = #tpu.dot_dimension_numbers<[1], [0], [0], [1], [0, 0, 1, 1], [], []>} : vector<8x16xf32>, vector<16x32xf32>, vector<8x32xf32> -> vector<8x32xf32>
    %263 = arith.addf %241, %262 : vector<8x32xf32>
    %c0_114 = arith.constant 0 : index
    %c0_115 = arith.constant 0 : index
    %264 = vector.load %arg21[%c0_114, %c0_115] : memref<16x32xf32, #tpu.memory_space<vmem>>, vector<8x32xf32>
    tpu.vector_store %arg21[%c0_114, %c0_115], %263 {strides = array<i32>} : memref<16x32xf32, #tpu.memory_space<vmem>>, vector<8x32xf32>,
    %265 = vector.extract_strided_slice %0 {offsets = [1, 0], sizes = [1, 8], strides = [1, 1]} : vector<2x8xf32> to vector<1x8xf32>
    %266 = vector.extract_strided_slice %215 {offsets = [8, 0], sizes = [8, 16], strides = [1, 1]} : vector<16x32xf32> to vector<8x16xf32>
    %267 = vector.extract_strided_slice %216 {offsets = [8, 0], sizes = [8, 16], strides = [1, 1]} : vector<16x32xf32> to vector<8x16xf32>
    %268 = vector.extract_strided_slice %217 {offsets = [8, 0], sizes = [8, 16], strides = [1, 1]} : vector<16x32xf32> to vector<8x16xf32>
    %cst_116 = arith.constant dense<0.000000e+00> : vector<8x8xf32>
    %269 = tpu.matmul %266, %267, %cst_116 {dimension_numbers = #tpu.dot_dimension_numbers<[1], [1], [0], [0], [0, 0, 1, 0], [], []>} : vector<8x16xf32>, vector<8x16xf32>, vector<8x8xf32> -> vector<8x8xf32>
    %cst_117 = arith.constant 2.500000e-01 : f32
    %270 = vector.broadcast %cst_117 : f32 to vector<8x8xf32>
    %271 = arith.mulf %269, %270 : vector<8x8xf32>
    %272 = vector.broadcast %265 : vector<1x8xf32> to vector<8x8xf32>
    %273 = arith.addf %271, %272 : vector<8x8xf32>
    %cst_118 = arith.constant dense<0xFF800000> : vector<8xf32>
    %274 = vector.multi_reduction <maximumf>, %273, %cst_118 [1] : vector<8x8xf32> to vector<8xf32>
    %275 = vector.shape_cast %274 : vector<8xf32> to vector<8x1xf32>
    %276 = vector.broadcast %275 : vector<8x1xf32> to vector<8x8xf32>
    %277 = arith.subf %273, %276 : vector<8x8xf32>
    %278 = math.exp %277 : vector<8x8xf32>
    %cst_119 = arith.constant dense<0.000000e+00> : vector<8xf32>
    %279 = vector.multi_reduction <add>, %278, %cst_119 [1] : vector<8x8xf32> to vector<8xf32>
    %280 = vector.shape_cast %279 : vector<8xf32> to vector<8x1xf32>
    %281 = tpu.reciprocal %280 {approx = true} : vector<8x1xf32> -> vector<8x1xf32>
    %282 = vector.broadcast %281 : vector<8x1xf32> to vector<8x8xf32>
    %283 = arith.mulf %278, %282 : vector<8x8xf32>
    %cst_120 = arith.constant dense<0.000000e+00> : vector<8x16xf32>
    %284 = tpu.matmul %283, %268, %cst_120 {dimension_numbers = #tpu.dot_dimension_numbers<[1], [0], [0], [1], [0, 0, 1, 1], [], []>} : vector<8x8xf32>, vector<8x16xf32>, vector<8x16xf32> -> vector<8x16xf32>
    %285 = vector.extract_strided_slice %219 {offsets = [0, 0], sizes = [16, 32], strides = [1, 1]} : vector<32x32xf32> to vector<16x32xf32>
    %cst_121 = arith.constant dense<0.000000e+00> : vector<8x32xf32>
    %286 = tpu.matmul %284, %285, %cst_121 {dimension_numbers = #tpu.dot_dimension_numbers<[1], [0], [0], [1], [0, 0, 1, 1], [], []>} : vector<8x16xf32>, vector<16x32xf32>, vector<8x32xf32> -> vector<8x32xf32>
    %287 = vector.extract_strided_slice %215 {offsets = [8, 16], sizes = [8, 16], strides = [1, 1]} : vector<16x32xf32> to vector<8x16xf32>
    %288 = vector.extract_strided_slice %216 {offsets = [8, 16], sizes = [8, 16], strides = [1, 1]} : vector<16x32xf32> to vector<8x16xf32>
    %289 = vector.extract_strided_slice %217 {offsets = [8, 16], sizes = [8, 16], strides = [1, 1]} : vector<16x32xf32> to vector<8x16xf32>
    %cst_122 = arith.constant dense<0.000000e+00> : vector<8x8xf32>
    %290 = tpu.matmul %287, %288, %cst_122 {dimension_numbers = #tpu.dot_dimension_numbers<[1], [1], [0], [0], [0, 0, 1, 0], [], []>} : vector<8x16xf32>, vector<8x16xf32>, vector<8x8xf32> -> vector<8x8xf32>
    %cst_123 = arith.constant 2.500000e-01 : f32
    %291 = vector.broadcast %cst_123 : f32 to vector<8x8xf32>
    %292 = arith.mulf %290, %291 : vector<8x8xf32>
    %293 = vector.broadcast %265 : vector<1x8xf32> to vector<8x8xf32>
    %294 = arith.addf %292, %293 : vector<8x8xf32>
    %cst_124 = arith.constant dense<0xFF800000> : vector<8xf32>
    %295 = vector.multi_reduction <maximumf>, %294, %cst_124 [1] : vector<8x8xf32> to vector<8xf32>
    %296 = vector.shape_cast %295 : vector<8xf32> to vector<8x1xf32>
    %297 = vector.broadcast %296 : vector<8x1xf32> to vector<8x8xf32>
    %298 = arith.subf %294, %297 : vector<8x8xf32>
    %299 = math.exp %298 : vector<8x8xf32>
    %cst_125 = arith.constant dense<0.000000e+00> : vector<8xf32>
    %300 = vector.multi_reduction <add>, %299, %cst_125 [1] : vector<8x8xf32> to vector<8xf32>
    %301 = vector.shape_cast %300 : vector<8xf32> to vector<8x1xf32>
    %302 = tpu.reciprocal %301 {approx = true} : vector<8x1xf32> -> vector<8x1xf32>
    %303 = vector.broadcast %302 : vector<8x1xf32> to vector<8x8xf32>
    %304 = arith.mulf %299, %303 : vector<8x8xf32>
    %cst_126 = arith.constant dense<0.000000e+00> : vector<8x16xf32>
    %305 = tpu.matmul %304, %289, %cst_126 {dimension_numbers = #tpu.dot_dimension_numbers<[1], [0], [0], [1], [0, 0, 1, 1], [], []>} : vector<8x8xf32>, vector<8x16xf32>, vector<8x16xf32> -> vector<8x16xf32>
    %306 = vector.extract_strided_slice %219 {offsets = [16, 0], sizes = [16, 32], strides = [1, 1]} : vector<32x32xf32> to vector<16x32xf32>
    %cst_127 = arith.constant dense<0.000000e+00> : vector<8x32xf32>
    %307 = tpu.matmul %305, %306, %cst_127 {dimension_numbers = #tpu.dot_dimension_numbers<[1], [0], [0], [1], [0, 0, 1, 1], [], []>} : vector<8x16xf32>, vector<16x32xf32>, vector<8x32xf32> -> vector<8x32xf32>
    %308 = arith.addf %286, %307 : vector<8x32xf32>
    %c8_128 = arith.constant 8 : index
    %c0_129 = arith.constant 0 : index
    %309 = vector.load %arg21[%c8_128, %c0_129] : memref<16x32xf32, #tpu.memory_space<vmem>>, vector<8x32xf32>
    tpu.vector_store %arg21[%c8_128, %c0_129], %308 {strides = array<i32>} : memref<16x32xf32, #tpu.memory_space<vmem>>, vector<8x32xf32>,
    %c0_130 = arith.constant 0 : index
    %c0_131 = arith.constant 0 : index
    %310 = vector.load %arg21[%c0_130, %c0_131] : memref<16x32xf32, #tpu.memory_space<vmem>>, vector<16x32xf32>
    %c1_132 = arith.constant 1 : index
    %c0_133 = arith.constant 0 : index
    %c0_134 = arith.constant 0 : index
    %311 = vector.load %arg7[%c1_132, %c0_133, %c0_134] : memref<2x1x32xf32, #tpu.memory_space<vmem>>, vector<1x1x32xf32>
    %312 = vector.shape_cast %311 : vector<1x1x32xf32> to vector<1x32xf32>
    %313 = vector.broadcast %312 : vector<1x32xf32> to vector<16x32xf32>
    %314 = arith.addf %310, %313 : vector<16x32xf32>
    %315 = arith.addf %314, %207 : vector<16x32xf32>
    %c1_135 = arith.constant 1 : index
    %c0_136 = arith.constant 0 : index
    %c0_137 = arith.constant 0 : index
    %316 = vector.load %arg8[%c1_135, %c0_136, %c0_137] : memref<2x1x32xf32, #tpu.memory_space<vmem>>, vector<1x1x32xf32>
    %317 = vector.shape_cast %316 : vector<1x1x32xf32> to vector<1x32xf32>
    %c1_138 = arith.constant 1 : index
    %c0_139 = arith.constant 0 : index
    %c0_140 = arith.constant 0 : index
    %318 = vector.load %arg9[%c1_138, %c0_139, %c0_140] : memref<2x1x32xf32, #tpu.memory_space<vmem>>, vector<1x1x32xf32>
    %319 = vector.shape_cast %318 : vector<1x1x32xf32> to vector<1x32xf32>
    %cst_141 = arith.constant dense<0.000000e+00> : vector<16xf32>
    %320 = vector.multi_reduction <add>, %315, %cst_141 [1] : vector<16x32xf32> to vector<16xf32>
    %321 = vector.shape_cast %320 : vector<16xf32> to vector<16x1xf32>
    %cst_142 = arith.constant 3.200000e+01 : f32
    %322 = vector.broadcast %cst_142 : f32 to vector<16x1xf32>
    %323 = arith.divf %321, %322 : vector<16x1xf32>
    %324 = vector.broadcast %323 : vector<16x1xf32> to vector<16x32xf32>
    %325 = arith.subf %315, %324 : vector<16x32xf32>
    %326 = arith.mulf %325, %325 : vector<16x32xf32>
    %cst_143 = arith.constant dense<0.000000e+00> : vector<16xf32>
    %327 = vector.multi_reduction <add>, %326, %cst_143 [1] : vector<16x32xf32> to vector<16xf32>
    %328 = vector.shape_cast %327 : vector<16xf32> to vector<16x1xf32>
    %cst_144 = arith.constant 3.200000e+01 : f32
    %329 = vector.broadcast %cst_144 : f32 to vector<16x1xf32>
    %330 = arith.divf %328, %329 : vector<16x1xf32>
    %cst_145 = arith.constant 9.99999996E-13 : f32
    %331 = vector.broadcast %cst_145 : f32 to vector<16x1xf32>
    %332 = arith.addf %330, %331 : vector<16x1xf32>
    %333 = math.rsqrt %332 : vector<16x1xf32>
    %334 = vector.broadcast %333 : vector<16x1xf32> to vector<16x32xf32>
    %335 = arith.mulf %325, %334 : vector<16x32xf32>
    %336 = vector.broadcast %317 : vector<1x32xf32> to vector<16x32xf32>
    %337 = arith.mulf %335, %336 : vector<16x32xf32>
    %338 = vector.broadcast %319 : vector<1x32xf32> to vector<16x32xf32>
    %339 = arith.addf %337, %338 : vector<16x32xf32>
    %c1_146 = arith.constant 1 : index
    %c0_147 = arith.constant 0 : index
    %c0_148 = arith.constant 0 : index
    %340 = vector.load %arg10[%c1_146, %c0_147, %c0_148] : memref<2x32x64xf32, #tpu.memory_space<vmem>>, vector<1x32x64xf32>
    %341 = vector.shape_cast %340 : vector<1x32x64xf32> to vector<32x64xf32>
    %cst_149 = arith.constant dense<0.000000e+00> : vector<16x64xf32>
    %342 = tpu.matmul %339, %341, %cst_149 {dimension_numbers = #tpu.dot_dimension_numbers<[1], [0], [0], [1], [0, 0, 1, 1], [], []>} : vector<16x32xf32>, vector<32x64xf32>, vector<16x64xf32> -> vector<16x64xf32>
    %c1_150 = arith.constant 1 : index
    %c0_151 = arith.constant 0 : index
    %c0_152 = arith.constant 0 : index
    %343 = vector.load %arg11[%c1_150, %c0_151, %c0_152] : memref<2x1x64xf32, #tpu.memory_space<vmem>>, vector<1x1x64xf32>
    %344 = vector.shape_cast %343 : vector<1x1x64xf32> to vector<1x64xf32>
    %345 = vector.broadcast %344 : vector<1x64xf32> to vector<16x64xf32>
    %346 = arith.addf %342, %345 : vector<16x64xf32>
    %cst_153 = arith.constant 5.000000e-01 : f32
    %347 = vector.broadcast %cst_153 : f32 to vector<16x64xf32>
    %348 = arith.mulf %347, %346 : vector<16x64xf32>
    %cst_154 = arith.constant 4.471500e-02 : f32
    %349 = vector.broadcast %cst_154 : f32 to vector<16x64xf32>
    %350 = arith.mulf %349, %346 : vector<16x64xf32>
    %351 = arith.mulf %350, %346 : vector<16x64xf32>
    %352 = arith.mulf %351, %346 : vector<16x64xf32>
    %353 = arith.addf %346, %352 : vector<16x64xf32>
    %cst_155 = arith.constant 0.797884583 : f32
    %354 = vector.broadcast %cst_155 : f32 to vector<16x64xf32>
    %355 = arith.mulf %354, %353 : vector<16x64xf32>
    %356 = math.tanh %355 : vector<16x64xf32>
    %cst_156 = arith.constant 1.000000e+00 : f32
    %357 = vector.broadcast %cst_156 : f32 to vector<16x64xf32>
    %358 = arith.addf %357, %356 : vector<16x64xf32>
    %359 = arith.mulf %348, %358 : vector<16x64xf32>
    %c1_157 = arith.constant 1 : index
    %c0_158 = arith.constant 0 : index
    %c0_159 = arith.constant 0 : index
    %360 = vector.load %arg12[%c1_157, %c0_158, %c0_159] : memref<2x64x32xf32, #tpu.memory_space<vmem>>, vector<1x64x32xf32>
    %361 = vector.shape_cast %360 : vector<1x64x32xf32> to vector<64x32xf32>
    %cst_160 = arith.constant dense<0.000000e+00> : vector<16x32xf32>
    %362 = tpu.matmul %359, %361, %cst_160 {dimension_numbers = #tpu.dot_dimension_numbers<[1], [0], [0], [1], [0, 0, 1, 1], [], []>} : vector<16x64xf32>, vector<64x32xf32>, vector<16x32xf32> -> vector<16x32xf32>
    %c1_161 = arith.constant 1 : index
    %c0_162 = arith.constant 0 : index
    %c0_163 = arith.constant 0 : index
    %363 = vector.load %arg13[%c1_161, %c0_162, %c0_163] : memref<2x1x32xf32, #tpu.memory_space<vmem>>, vector<1x1x32xf32>
    %364 = vector.shape_cast %363 : vector<1x1x32xf32> to vector<1x32xf32>
    %365 = vector.broadcast %364 : vector<1x32xf32> to vector<16x32xf32>
    %366 = arith.addf %362, %365 : vector<16x32xf32>
    %367 = arith.addf %366, %339 : vector<16x32xf32>
    %c1_164 = arith.constant 1 : index
    %c0_165 = arith.constant 0 : index
    %c0_166 = arith.constant 0 : index
    %368 = vector.load %arg14[%c1_164, %c0_165, %c0_166] : memref<2x1x32xf32, #tpu.memory_space<vmem>>, vector<1x1x32xf32>
    %369 = vector.shape_cast %368 : vector<1x1x32xf32> to vector<1x32xf32>
    %c1_167 = arith.constant 1 : index
    %c0_168 = arith.constant 0 : index
    %c0_169 = arith.constant 0 : index
    %370 = vector.load %arg15[%c1_167, %c0_168, %c0_169] : memref<2x1x32xf32, #tpu.memory_space<vmem>>, vector<1x1x32xf32>
    %371 = vector.shape_cast %370 : vector<1x1x32xf32> to vector<1x32xf32>
    %cst_170 = arith.constant dense<0.000000e+00> : vector<16xf32>
    %372 = vector.multi_reduction <add>, %367, %cst_170 [1] : vector<16x32xf32> to vector<16xf32>
    %373 = vector.shape_cast %372 : vector<16xf32> to vector<16x1xf32>
    %cst_171 = arith.constant 3.200000e+01 : f32
    %374 = vector.broadcast %cst_171 : f32 to vector<16x1xf32>
    %375 = arith.divf %373, %374 : vector<16x1xf32>
    %376 = vector.broadcast %375 : vector<16x1xf32> to vector<16x32xf32>
    %377 = arith.subf %367, %376 : vector<16x32xf32>
    %378 = arith.mulf %377, %377 : vector<16x32xf32>
    %cst_172 = arith.constant dense<0.000000e+00> : vector<16xf32>
    %379 = vector.multi_reduction <add>, %378, %cst_172 [1] : vector<16x32xf32> to vector<16xf32>
    %380 = vector.shape_cast %379 : vector<16xf32> to vector<16x1xf32>
    %cst_173 = arith.constant 3.200000e+01 : f32
    %381 = vector.broadcast %cst_173 : f32 to vector<16x1xf32>
    %382 = arith.divf %380, %381 : vector<16x1xf32>
    %cst_174 = arith.constant 9.99999996E-13 : f32
    %383 = vector.broadcast %cst_174 : f32 to vector<16x1xf32>
    %384 = arith.addf %382, %383 : vector<16x1xf32>
    %385 = math.rsqrt %384 : vector<16x1xf32>
    %386 = vector.broadcast %385 : vector<16x1xf32> to vector<16x32xf32>
    %387 = arith.mulf %377, %386 : vector<16x32xf32>
    %388 = vector.broadcast %369 : vector<1x32xf32> to vector<16x32xf32>
    %389 = arith.mulf %387, %388 : vector<16x32xf32>
    %390 = vector.broadcast %371 : vector<1x32xf32> to vector<16x32xf32>
    %391 = arith.addf %389, %390 : vector<16x32xf32>
    %c0_175 = arith.constant 0 : index
    %c0_176 = arith.constant 0 : index
    %392 = vector.load %arg16[%c0_175, %c0_176] : memref<32x32xf32, #tpu.memory_space<vmem>>, vector<32x32xf32>
    %cst_177 = arith.constant dense<0.000000e+00> : vector<16x32xf32>
    %393 = tpu.matmul %391, %392, %cst_177 {dimension_numbers = #tpu.dot_dimension_numbers<[1], [0], [0], [1], [0, 0, 1, 1], [], []>} : vector<16x32xf32>, vector<32x32xf32>, vector<16x32xf32> -> vector<16x32xf32>
    %c0_178 = arith.constant 0 : index
    %c0_179 = arith.constant 0 : index
    %394 = vector.load %arg17[%c0_178, %c0_179] : memref<1x32xf32, #tpu.memory_space<vmem>>, vector<1x32xf32>
    %395 = vector.broadcast %394 : vector<1x32xf32> to vector<16x32xf32>
    %396 = arith.addf %393, %395 : vector<16x32xf32>
    %397 = math.tanh %396 : vector<16x32xf32>
    %c0_180 = arith.constant 0 : index
    %c0_181 = arith.constant 0 : index
    %398 = vector.load %arg18[%c0_180, %c0_181] : memref<1x32xf32, #tpu.memory_space<vmem>>, vector<1x32xf32>
    %399 = vector.broadcast %398 : vector<1x32xf32> to vector<16x32xf32>
    %400 = arith.mulf %397, %399 : vector<16x32xf32>
    %cst_182 = arith.constant dense<0.000000e+00> : vector<16xf32>
    %401 = vector.multi_reduction <add>, %400, %cst_182 [1] : vector<16x32xf32> to vector<16xf32>
    %402 = vector.shape_cast %401 : vector<16xf32> to vector<16x1xf32>
    %c0_183 = arith.constant 0 : index
    %c0_184 = arith.constant 0 : index
    %403 = vector.load %arg19[%c0_183, %c0_184] : memref<1x1xf32, #tpu.memory_space<vmem>>, vector<1x1xf32>
    %404 = vector.broadcast %403 : vector<1x1xf32> to vector<16x1xf32>
    %405 = arith.addf %402, %404 : vector<16x1xf32>
    %c0_185 = arith.constant 0 : index
    %c0_186 = arith.constant 0 : index
    %406 = vector.load %arg20[%c0_185, %c0_186] : memref<16x1xf32, #tpu.memory_space<vmem>>, vector<16x1xf32>
    tpu.vector_store %arg20[%c0_185, %c0_186], %405 {strides = array<i32>} : memref<16x1xf32, #tpu.memory_space<vmem>>, vector<16x1xf32>,
    return
  }
}

</mosaic_0001>

<bundles_post_ra>
// kernel: bert_disney_reviews_forward.1
= control target key start
LH: loop header
LB: loop body
LE: loop exit
PB: predicated region body
PF: predicated region fallthrough
CT: control target
= control target key end

     0   :  { %vm72_vm0 = vcmask 261120   ;;  %v1624_v2 = vmov 32.0   ;;  %s1625_s27 = smov 80   ;;  %s2227_s28 = smov 64   ;;  %vm178_vm5 = vcmask 130048   ;;  %vm206_vm6 = vcmask 64512   ;;  %s2203_s0 = inlined_call_operand.vmem [shape: f32[16,32], index: 0, kind: input, shape index: {}]   ;;  %s2204_s2 = inlined_call_operand.vmem [shape: f32[1,32], index: 2, kind: input, shape index: {}]   ;;  %s2205_s3 = inlined_call_operand.vmem [shape: f32[1,32], index: 3, kind: input, shape index: {}]   ;;  %s2206_s5 = inlined_call_operand.vmem [shape: f32[2,1,96], index: 5, kind: input, shape index: {}]   ;;  %s2207_s4 = inlined_call_operand.vmem [shape: f32[2,32,96], index: 4, kind: input, shape index: {}]   ;;  %s2208_s1 = inlined_call_operand.vmem [shape: f32[2,8], index: 1, kind: input, shape index: {}]   ;;  %s2209_s6 = inlined_call_operand.vmem [shape: f32[2,32,32], index: 6, kind: input, shape index: {}]   ;;  %s2210_s7 = inlined_call_operand.vmem [shape: f32[2,1,32], index: 7, kind: input, shape index: {}]   ;;  %s2211_s8 = inlined_call_operand.vmem [shape: f32[2,1,32], index: 8, kind: input, shape index: {}]   ;;  %s2212_s9 = inlined_call_operand.vmem [shape: f32[2,1,32], index: 9, kind: input, shape index: {}]   ;;  %s2213_s10 = inlined_call_operand.vmem [shape: f32[2,32,64], index: 10, kind: input, shape index: {}]   ;;  %s2214_s11 = inlined_call_operand.vmem [shape: f32[2,1,64], index: 11, kind: input, shape index: {}]   ;;  %s2215_s12 = inlined_call_operand.vmem [shape: f32[2,64,32], index: 12, kind: input, shape index: {}]   ;;  %s2216_s13 = inlined_call_operand.vmem [shape: f32[2,1,32], index: 13, kind: input, shape index: {}]   ;;  %s2217_s14 = inlined_call_operand.vmem [shape: f32[2,1,32], index: 14, kind: input, shape index: {}]   ;;  %s2218_s15 = inlined_call_operand.vmem [shape: f32[2,1,32], index: 15, kind: input, shape index: {}]   ;;  %s2219_s16 = inlined_call_operand.vmem [shape: f32[32,32], index: 16, kind: input, shape index: {}]   ;;  %s2220_s17 = inlined_call_operand.vmem [shape: f32[1,32], index: 17, kind: input, shape index: {}]   ;;  %s2221_s18 = inlined_call_operand.vmem [shape: f32[1,32], index: 18, kind: input, shape index: {}]   ;;  %s2222_s19 = inlined_call_operand.<no memory space> [shape: f32[1,1], index: 19, kind: input, shape index: {}]   ;;  %s2223_s20 = inlined_call_operand.vmem [shape: f32[16,1], index: 20, kind: output, shape index: {}]  }
   0x1   :  { %2229 = sst [smem:[#allocation4_spill]] %s2203_s0  ;;  %1558 = vrcp.f32 %v1624_v2  ;;  %v1797_v41 = vld [vmem:[%s2208_s1] sm:$0x3]  ;;  %s1628_s1 = smov 112   ;;  %v1814_v61 = vld [vmem:[%s2209_s6 + $0x8] sm:$0xff]  ;;  %vm672_vm13 = vcmask 523264  }
   0x2   :  { %2230 = sst [smem:[#allocation5_spill]] %s2204_s2  ;;  %v1800_v42 = vperm.slane %v1797_v41, 0  ;;  %351 = vmatpush.msra.mxu3 %v1814_v61 }
   0x3   :  { %2231 = sst [smem:[#allocation6_spill]] %s2205_s3  ;;  %s1629_s3 = smov 48  }
   0x4   :  { %2232 = sst [smem:[#allocation7_spill]] %s2206_s5 }
   0x5   :  { %2233 = sst [smem:[#allocation8_spill]] %s2207_s4  ;;  %s1627_s4 = smov 96  }
   0x6   :  { %s2234_s23 = sld [smem:[#allocation4_spill]] }
   0x7   :  { %v1559_v3 = vpop.eup %1558  ;;  %s2235_s25 = sld [smem:[#allocation8_spill]] }
   0x8   :  { %v80_v4 = vmul.f32 32.0, %v1559_v3  ;;  %vm84_vm1 = vweird.f32 %v1559_v3  ;;  %s2236_s21 = sld [smem:[#allocation5_spill]] }
   0x9   :  { %s2237_s24 = sld [smem:[#allocation6_spill]] }
   0xa   :  { %v81_v5 = vsub.f32 1.0, %v80_v4  ;;  %s2238_s26 = sld [smem:[#allocation7_spill]] }
   0xc   :  { %v68_v0 = vld [vmem:[%s2234_s23] sm:$0xff]  ;;  %v82_v6 = vmul.f32 %v1559_v3, %v81_v5  ;;  %v69_v39 = vld [vmem:[%s2234_s23 + $0x8] sm:$0xff] }
   0xd   :  { %v73_v1 = vsel %vm72_vm0, %v68_v0, 0.0  ;;  %v137_v14 = vld [vmem:[%s2235_s25 + $0x18] sm:$0xff]  ;;  %v136_v15 = vld [vmem:[%s2235_s25 + $0x10] sm:$0xff]  ;;  %v135_v16 = vld [vmem:[%s2235_s25 + $0x8] sm:$0xff]  ;;  %v76_v40 = vsel %vm72_vm0, %v69_v39, 0.0 }
   0xe   :  { %74 = vadd.xlane.f32.xlu0 %v73_v1  ;;  %v83_v7 = vadd.f32 %v1559_v3, %v82_v6  ;;  %160 = vmatpush.msra.mxu0 %v137_v14  ;;  %v134_v17 = vld [vmem:[%s2235_s25] sm:$0xff] }
   0xf   :  { %v1759_v27 = vld [vmem:[%s2236_s21] ss:$0 sm:$0xff] }
  0x10   :  { %v1739_v8 = vsel %vm84_vm1, %v1559_v3, %v83_v7  ;;  %161 = vmatpush.msra.mxu0 %v136_v15  ;;  %v1764_v30 = vld [vmem:[%s2237_s24] ss:$0 sm:$0xff] }
  0x11   :  { %v1775_v33 = vld [vmem:[%s2238_s26] ss:$0 sm:$0xff] }
  0x12   :  { %162 = vmatpush.msra.mxu0 %v135_v16 }
  0x14   :  { %163 = vmatpush.msra.mxu0 %v134_v17 }
  0x81   :  { %v75_v9 = vpop.xlane.xlu0 %74 }
  0x82   :  { %v86_v10 = vmul.f32 %v1739_v8, %v75_v9 }
  0x84   :  { %v88_v11 = vsub.f32 %v68_v0, %v86_v10 }
  0x86   :  { %v90_v12 = vmul.f32 %v88_v11, %v88_v11 }
  0x88   :  { %v92_v13 = vsel %vm72_vm0, %v90_v12, 0.0  ;;  %v1827_v12 = vld [vmem:[%s2209_s6] sm:$0xff] }
  0x89   :  { %93 = vadd.xlane.f32.xlu0 %v92_v13  ;;  %352 = vmatpush.msra.mxu3 %v1827_v12 }
  0xfc   :  { %v94_v18 = vpop.xlane.xlu0 %93 }
  0xfd   :  { %v98_v19 = vmul.f32 %v94_v18, %v1739_v8 }
  0xff   :  { %v100_v20 = vadd.f32 1e-12, %v98_v19 }
 0x101   :  { %1560 = vrsqrt.f32 %v100_v20  ;;  %vm108_vm3 = vweird.f32 %v100_v20 }
 0x107   :  { %v1561_v21 = vpop.eup %1560 }
 0x108   :  { %v103_v22 = vmul.f32 %v1561_v21, %v100_v20  ;;  %vm109_vm2 = vweird.f32 %v1561_v21 }
 0x109   :  { %vm110_vm4 = vmor %vm108_vm3, %vm109_vm2 }
 0x10a   :  { %v104_v23 = vmul.f32 %v1561_v21, %v103_v22 }
 0x10c   :  { %v105_v24 = vmul.f32 0.5, %v104_v23 }
 0x10e   :  { %v106_v25 = vsub.f32 1.5, %v105_v24 }
 0x110   :  { %v107_v26 = vmul.f32 %v1561_v21, %v106_v25 }
 0x112   :  { %v111_v28 = vsel %vm110_vm4, %v1561_v21, %v107_v26 }
 0x113   :  { %v122_v29 = vmul.f32 %v111_v28, %v88_v11 }
 0x115   :  { %v127_v31 = vmul.f32 %v1759_v27, %v122_v29 }
 0x117   :  { %v1768_v32 = vadd.f32 %v1764_v30, %v127_v31 }
 0x119   :  { %1457 = vmatmul.msk.f32.vlgmr.msra.gmra.mxu0 %vm72_vm0, %v1768_v32 }
 0x196   :  { %v165_v34 = vpop.f32.mrf.mxu0 }
 0x197   :  { %v1778_v35 = vadd.f32 %v1775_v33, %v165_v34 }
 0x199   :  { %246 = vrot.lane.b32.xlu0 %v1778_v35, %s1625_s27  ;;  %218 = vrot.lane.b32.xlu2 %v1778_v35, %s2227_s28 }
 0x19a   :  { %176 = vrot.lane.b32.xlu1 %v1778_v35, %s1627_s4 }
 0x1c3   :  { %77 = vadd.xlane.f32.xlu0 %v76_v40  ;;  %v173_v40 = vld [vmem:[%s2209_s6 + $0x10] sm:$0xff] }
 0x1f3   :  { %v219_v36 = vpop.permute.xlu2 %218 }
 0x1f4   :  { %239 = vmatpush.msra.mxu2 %v219_v36 }
 0x20b   :  { %v247_v37 = vpop.permute.xlu0 %246 }
 0x20c   :  { %v177_v38 = vpop.permute.xlu1 %176  ;;  %1462 = vmatpush.xpose.msk.msrb.mxu2 %vm178_vm5, %v247_v37 }
 0x20d   :  { %1459 = vmatpush.xpose.msk.msra.mxu1 %vm178_vm5, %v177_v38 }
 0x210   :  { %1460 = vmatmul.msk.f32.vlgmr.msra.gmra.mxu1 %vm178_vm5, %v1778_v35 }
 0x236   :  { %v78_v52 = vpop.xlane.xlu0 %77 }
 0x237   :  { %v87_v53 = vmul.f32 %v1739_v8, %v78_v52 }
 0x239   :  { %v89_v54 = vsub.f32 %v69_v39, %v87_v53  ;;  %v1869_v53 = vld [vmem:[%s2210_s7] ss:$0 sm:$0xff] }
 0x23b   :  { %v91_v55 = vmul.f32 %v89_v54, %v89_v54 }
 0x23d   :  { %v95_v56 = vsel %vm72_vm0, %v91_v55, 0.0 }
 0x28d   :  { %v200_v43 = vpop.f32.mrf.mxu1 }
 0x28e   :  { %v203_v44 = vmul.f32 0.25, %v200_v43 }
 0x290   :  { %v205_v45 = vadd.f32 %v1800_v42, %v203_v44 }
 0x292   :  { %v207_v46 = vsel %vm206_vm6, %v205_v45, -inf }
 0x293   :  { %208 = vmax.xlane.f32.xlu1 %v207_v46 }
 0x306   :  { %v209_v47 = vpop.xlane.xlu1 %208 }
 0x307   :  { %v210_v48 = vsub.f32 %v205_v45, %v209_v47 }
 0x309   :  { %v211_v49 = vmul.f32 1.442695, %v210_v48 }
 0x30b   :  { %1562 = vpow2.f32 %v211_v49 }
 0x311   :  { %v1563_v50 = vpop.eup %1562 }
 0x312   :  { %v213_v51 = vsel %vm206_vm6, %v1563_v50, 0.0 }
 0x313   :  { %214 = vadd.xlane.f32.xlu2 %v213_v51 }
 0x32b   :  { %244 = vrot.lane.b32.xlu2 %v1778_v35, %s1628_s1 }
 0x354   :  { %96 = vadd.xlane.f32.xlu2 %v95_v56 }
 0x386   :  { %v215_v57 = vpop.xlane.xlu2 %214 }
 0x387   :  { %1564 = vrcp.f32 %v215_v57 }
 0x38d   :  { %v1565_v58 = vpop.eup %1564 }
 0x38e   :  { %v217_v59 = vmul.f32 %v1565_v58, %v1563_v50  ;;  %v245_v60 = vpop.permute.xlu2 %244 }
 0x390   :  { %1461 = vmatmul.msk.f32.vlgmr.msra.gmra.mxu2 %vm206_vm6, %v217_v59 }
 0x398   :  { %1463 = vmatmul.msk.f32.vlgmr.msrb.gmra.mxu2 %vm178_vm5, %v245_v60 }
 0x3c7   :  { %v97_v62 = vpop.xlane.xlu2 %96 }
 0x3c8   :  { %v99_v63 = vmul.f32 %v97_v62, %v1739_v8 }
 0x3ca   :  { %v101_v0 = vadd.f32 1e-12, %v99_v63 }
 0x3cc   :  { %1566 = vrsqrt.f32 %v101_v0  ;;  %vm118_vm7 = vweird.f32 %v101_v0 }
 0x3d2   :  { %v1567_v1 = vpop.eup %1566 }
 0x3d3   :  { %v113_v2 = vmul.f32 %v1567_v1, %v101_v0  ;;  %vm119_vm8 = vweird.f32 %v1567_v1 }
 0x3d4   :  { %vm120_vm9 = vmor %vm118_vm7, %vm119_vm8 }
 0x3d5   :  { %v114_v3 = vmul.f32 %v1567_v1, %v113_v2 }
 0x3d7   :  { %v115_v4 = vmul.f32 0.5, %v114_v3 }
 0x3d9   :  { %v116_v5 = vsub.f32 1.5, %v115_v4 }
 0x3db   :  { %v117_v6 = vmul.f32 %v1567_v1, %v116_v5 }
 0x3dd   :  { %v121_v7 = vsel %vm120_vm9, %v1567_v1, %v117_v6 }
 0x3de   :  { %v123_v9 = vmul.f32 %v121_v7, %v89_v54 }
 0x3e0   :  { %v128_v10 = vmul.f32 %v1759_v27, %v123_v9 }
 0x3e2   :  { %v1820_v11 = vadd.f32 %v1764_v30, %v128_v10 }
 0x3e4   :  { %1458 = vmatmul.msk.f32.gmra.mxu0 %vm72_vm0, %v1820_v11 }
 0x413   :  { %v241_v13 = vpop.f32.mrf.mxu2 }
 0x414   :  { %1466 = vmatmul.msk.f32.vlgmr.msra.gmra.mxu3 %vm178_vm5, %v241_v13  ;;  %v608_v13 = vld [vmem:[%s2213_s10 + $0x18] sm:$0xff] }
 0x41b   :  { %v269_v14 = vpop.f32.mrf.mxu2 }
 0x41c   :  { %v272_v15 = vmul.f32 0.25, %v269_v14  ;;  %v607_v14 = vld [vmem:[%s2213_s10 + $0x10] sm:$0xff] }
 0x41e   :  { %v273_v16 = vadd.f32 %v272_v15, %v1800_v42  ;;  %v606_v15 = vld [vmem:[%s2213_s10 + $0x8] sm:$0xff] }
 0x420   :  { %v274_v17 = vsel %vm206_vm6, %v273_v16, -inf }
 0x421   :  { %275 = vmax.xlane.f32.xlu1 %v274_v17 }
 0x461   :  { %v168_v18 = vpop.f32.mrf.mxu0 }
 0x462   :  { %v1834_v19 = vadd.f32 %v1775_v33, %v168_v18  ;;  %v174_v33 = vld [vmem:[%s2209_s6 + $0x18] sm:$0xff] }
 0x463   :  { %328 = vmatpush.msrb.mxu1 %v174_v33 }
 0x464   :  { %427 = vrot.lane.b32.xlu0 %v1834_v19, %s1625_s27  ;;  %425 = vrot.lane.b32.xlu2 %v1834_v19, %s1628_s1 }
 0x465   :  { %329 = vmatpush.msrb.mxu1 %v173_v40 }
 0x494   :  { %v276_v20 = vpop.xlane.xlu1 %275 }
 0x495   :  { %v277_v21 = vsub.f32 %v273_v16, %v276_v20 }
 0x497   :  { %v278_v22 = vmul.f32 1.442695, %v277_v21  ;;  %v354_v34 = vpop.f32.mrf.mxu3 }
 0x499   :  { %1568 = vpow2.f32 %v278_v22 }
 0x49f   :  { %v1569_v23 = vpop.eup %1568 }
 0x4a0   :  { %v280_v24 = vsel %vm206_vm6, %v1569_v23, 0.0 }
 0x4a1   :  { %281 = vadd.xlane.f32.xlu1 %v280_v24 }
 0x4ba   :  { %285 = vrot.lane.b32.xlu1 %v1778_v35, %s1629_s3  ;;  %v1855_v35 = vperm.slane %v1797_v41, 1 }
 0x4be   :  { %v426_v26 = vpop.permute.xlu2 %425 }
 0x4c2   :  { %359 = vrot.lane.b32.xlu1 %v1834_v19, %s1627_s4 }
 0x4d6   :  { %v428_v25 = vpop.permute.xlu0 %427 }
 0x4d7   :  { %1470 = vmatpush.xpose.msk.msrb.mxu3 %vm178_vm5, %v428_v25 }
 0x4da   :  { %1471 = vmatmul.msk.f32.vlgmr.msrb.gmra.mxu3 %vm178_vm5, %v426_v26 }
 0x4db   :  { %631 = vmatpush.msra.mxu3 %v608_v13 }
 0x4dd   :  { %632 = vmatpush.msra.mxu3 %v607_v14 }
 0x4df   :  { %633 = vmatpush.msra.mxu3 %v606_v15 }
 0x514   :  { %v282_v27 = vpop.xlane.xlu1 %281 }
 0x515   :  { %1570 = vrcp.f32 %v282_v27  ;;  %v1901_v27 = vld [vmem:[%s2211_s8] ss:$0 sm:$0xff] }
 0x51b   :  { %v1571_v28 = vpop.eup %1570 }
 0x51c   :  { %v284_v29 = vmul.f32 %v1571_v28, %v1569_v23 }
 0x52c   :  { %v286_v30 = vpop.permute.xlu1 %285 }
 0x52d   :  { %306 = vmatpush.msra.mxu2 %v286_v30  ;;  %v1907_v30 = vld [vmem:[%s2212_s9] ss:$0 sm:$0xff] }
 0x52e   :  { %1464 = vmatmul.msk.f32.vlgmr.msra.gmra.mxu2 %vm206_vm6, %v284_v29 }
 0x534   :  { %v360_v31 = vpop.permute.xlu1 %359 }
 0x535   :  { %1467 = vmatpush.xpose.msk.msrb.mxu2 %vm178_vm5, %v360_v31 }
 0x538   :  { %1468 = vmatmul.msk.f32.vlgmr.msrb.gmra.mxu2 %vm178_vm5, %v1834_v19 }
 0x539   :  { %509 = vmatpush.msra.mxu2 %v174_v33 }
 0x53b   :  { %510 = vmatpush.msra.mxu2 %v173_v40  ;;  %v663_v40 = vld [vmem:[%s2215_s12 + $0x18] sm:$0xff] }
 0x55d   :  { %v450_v36 = vpop.f32.mrf.mxu3 }
 0x55e   :  { %v453_v37 = vmul.f32 0.25, %v450_v36  ;;  %v667_v36 = vld [vmem:[%s2215_s12 + $0x38] sm:$0xff] }
 0x560   :  { %v454_v38 = vadd.f32 %v453_v37, %v1855_v35  ;;  %v666_v37 = vld [vmem:[%s2215_s12 + $0x30] sm:$0xff] }
 0x562   :  { %v455_v39 = vsel %vm206_vm6, %v454_v38, -inf }
 0x563   :  { %456 = vmax.xlane.f32.xlu0 %v455_v39  ;;  %v664_v39 = vld [vmem:[%s2215_s12 + $0x20] sm:$0xff] }
 0x5b1   :  { %v308_v43 = vpop.f32.mrf.mxu2 }
 0x5b2   :  { %1465 = vmatmul.msk.f32.vlgmr.msrb.gmra.mxu1 %vm178_vm5, %v308_v43  ;;  %v662_v43 = vld [vmem:[%s2215_s12 + $0x10] sm:$0xff] }
 0x5bb   :  { %v382_v44 = vpop.f32.mrf.mxu2 }
 0x5bc   :  { %v385_v45 = vmul.f32 0.25, %v382_v44 }
 0x5be   :  { %v387_v41 = vadd.f32 %v1855_v35, %v385_v45  ;;  %v661_v45 = vld [vmem:[%s2215_s12 + $0x8] sm:$0xff] }
 0x5c0   :  { %v388_v46 = vsel %vm206_vm6, %v387_v41, -inf }
 0x5c1   :  { %389 = vmax.xlane.f32.xlu2 %v388_v46  ;;  %v1941_v46 = vld [vmem:[%s2214_s11] ss:$0 sm:$0xff] }
 0x5d6   :  { %v457_v49 = vpop.xlane.xlu0 %456 }
 0x5d7   :  { %v458_v51 = vsub.f32 %v454_v38, %v457_v49  ;;  %v665_v38 = vld [vmem:[%s2215_s12 + $0x28] sm:$0xff] }
 0x5d9   :  { %v459_v55 = vmul.f32 1.442695, %v458_v51 }
 0x62f   :  { %v331_v47 = vpop.f32.mrf.mxu1 }
 0x630   :  { %v355_v48 = vadd.f32 %v354_v34, %v331_v47 }
 0x632   :  { %357 = vst.msk [vmem:[#allocation2] sm:$0xff] %vm72_vm0, %v355_v48 }
 0x634   :  { %v390_v50 = vpop.xlane.xlu2 %389 }
 0x635   :  { %v391_v52 = vsub.f32 %v387_v41, %v390_v50  ;;  %v660_v41 = vld [vmem:[%s2215_s12] sm:$0xff] }
 0x637   :  { %v392_v54 = vmul.f32 1.442695, %v391_v52 }
 0x639   :  { %1572 = vpow2.f32 %v392_v54  ;;  %v539_v56 = vld [vmem:[#allocation2] sm:$0xff] }
 0x63a   :  { %v545_v57 = vadd.f32 %v1869_v53, %v539_v56  ;;  %1574 = vpow2.f32 %v459_v55 }
 0x63c   :  { %v547_v58 = vadd.f32 %v545_v57, %v1768_v32 }
 0x63e   :  { %v551_v59 = vsel %vm72_vm0, %v547_v58, 0.0 }
 0x63f   :  { %v1573_v60 = vpop.eup %1572  ;;  %552 = vadd.xlane.f32.xlu1 %v551_v59 }
 0x640   :  { %v394_v62 = vsel %vm206_vm6, %v1573_v60, 0.0  ;;  %v1575_v63 = vpop.eup %1574 }
 0x641   :  { %395 = vadd.xlane.f32.xlu2 %v394_v62  ;;  %v461_v0 = vsel %vm206_vm6, %v1575_v63, 0.0 }
 0x647   :  { %462 = vadd.xlane.f32.xlu1 %v461_v0 }
 0x660   :  { %399 = vrot.lane.b32.xlu1 %v1834_v19, %s2227_s28 }
 0x6b2   :  { %v553_v1 = vpop.xlane.xlu1 %552 }
 0x6b3   :  { %v557_v2 = vmul.f32 %v553_v1, %v1739_v8 }
 0x6b4   :  { %v396_v5 = vpop.xlane.xlu2 %395 }
 0x6b5   :  { %v559_v3 = vsub.f32 %v547_v58, %v557_v2  ;;  %1576 = vrcp.f32 %v396_v5 }
 0x6b7   :  { %v561_v32 = vmul.f32 %v559_v3, %v559_v3 }
 0x6b9   :  { %v563_v4 = vsel %vm72_vm0, %v561_v32, 0.0 }
 0x6ba   :  { %564 = vadd.xlane.f32.xlu0 %v563_v4  ;;  %v463_v6 = vpop.xlane.xlu1 %462 }
 0x6bb   :  { %v1577_v7 = vpop.eup %1576 }
 0x6bc   :  { %v398_v9 = vmul.f32 %v1577_v7, %v1573_v60 }
 0x6ce   :  { %466 = vrot.lane.b32.xlu0 %v1834_v19, %s1629_s3 }
 0x6d2   :  { %v400_v10 = vpop.permute.xlu1 %399 }
 0x6d3   :  { %420 = vmatpush.msra.mxu1 %v400_v10 }
 0x6d4   :  { %1469 = vmatmul.msk.f32.vlgmr.msra.gmra.mxu1 %vm206_vm6, %v398_v9 }
 0x6d5   :  { %532 = vmatpush.msrb.mxu1 %v1814_v61  ;;  %v605_v61 = vld [vmem:[%s2213_s10] sm:$0xff] }
 0x6d6   :  { %634 = vmatpush.msra.mxu3 %v605_v61 }
 0x6d7   :  { %533 = vmatpush.msrb.mxu1 %v1827_v12 }
 0x72d   :  { %v565_v12 = vpop.xlane.xlu0 %564 }
 0x72e   :  { %v569_v16 = vmul.f32 %v565_v12, %v1739_v8 }
 0x730   :  { %v571_v17 = vadd.f32 1e-12, %v569_v16 }
 0x732   :  { %1578 = vrsqrt.f32 %v571_v17  ;;  %vm579_vm11 = vweird.f32 %v571_v17 }
 0x733   :  { %1580 = vrcp.f32 %v463_v6 }
 0x738   :  { %v1579_v18 = vpop.eup %1578 }
 0x739   :  { %v574_v19 = vmul.f32 %v1579_v18, %v571_v17  ;;  %v1581_v21 = vpop.eup %1580  ;;  %vm580_vm10 = vweird.f32 %v1579_v18 }
 0x73a   :  { %v465_v25 = vmul.f32 %v1581_v21, %v1575_v63  ;;  %vm581_vm12 = vmor %vm579_vm11, %vm580_vm10 }
 0x73b   :  { %v575_v20 = vmul.f32 %v1579_v18, %v574_v19  ;;  %v1482_v19 = vld [vmem:[%s2235_s25 + $0x38] sm:$0xff] }
 0x73c   :  { %788 = vmatpush.msrb.mxu2 %v1482_v19 }
 0x73d   :  { %v576_v22 = vmul.f32 0.5, %v575_v20 }
 0x73f   :  { %v577_v23 = vsub.f32 1.5, %v576_v22  ;;  %v1481_v22 = vld [vmem:[%s2235_s25 + $0x30] sm:$0xff] }
 0x740   :  { %v467_v24 = vpop.permute.xlu0 %466  ;;  %789 = vmatpush.msrb.mxu2 %v1481_v22 }
 0x741   :  { %v578_v26 = vmul.f32 %v1579_v18, %v577_v23  ;;  %487 = vmatpush.msrb.mxu0 %v467_v24  ;;  %v1480_v24 = vld [vmem:[%s2235_s25 + $0x28] sm:$0xff] }
 0x742   :  { %1472 = vmatmul.msk.f32.vlgmr.msrb.gmra.mxu0 %vm206_vm6, %v465_v25  ;;  %v1479_v25 = vld [vmem:[%s2235_s25 + $0x20] sm:$0xff]  ;;  %790 = vmatpush.msrb.mxu2 %v1480_v24 }
 0x743   :  { %v582_v28 = vsel %vm581_vm12, %v1579_v18, %v578_v26  ;;  %687 = vmatpush.msra.mxu0 %v667_v36 }
 0x744   :  { %v593_v29 = vmul.f32 %v582_v28, %v559_v3  ;;  %v1952_v3 = vld [vmem:[%s2216_s13] ss:$0 sm:$0xff]  ;;  %791 = vmatpush.msrb.mxu2 %v1479_v25 }
 0x745   :  { %688 = vmatpush.msra.mxu0 %v666_v37 }
 0x746   :  { %v598_v31 = vmul.f32 %v1901_v27, %v593_v29 }
 0x747   :  { %689 = vmatpush.msra.mxu0 %v665_v38 }
 0x748   :  { %v603_v33 = vadd.f32 %v1907_v30, %v598_v31 }
 0x749   :  { %690 = vmatpush.msra.mxu0 %v664_v39 }
 0x74a   :  { %1475 = vmatmul.msk.f32.vlgmr.msra.gmra.mxu3 %vm72_vm0, %v603_v33 }
 0x74b   :  { %691 = vmatpush.msra.mxu0 %v663_v40 }
 0x74d   :  { %692 = vmatpush.msra.mxu0 %v662_v43 }
 0x74f   :  { %693 = vmatpush.msra.mxu0 %v661_v45 }
 0x751   :  { %v422_v34 = vpop.f32.mrf.mxu1  ;;  %694 = vmatpush.msra.mxu0 %v660_v41 }
 0x752   :  { %1474 = vmatmul.msk.f32.vlgmr.msrb.gmra.mxu1 %vm178_vm5, %v422_v34 }
 0x7bf   :  { %v489_v44 = vpop.f32.mrf.mxu0 }
 0x7c0   :  { %1473 = vmatmul.msk.f32.vlgmr.msra.gmra.mxu2 %vm178_vm5, %v489_v44 }
 0x7cd   :  { %v636_v47 = vpop.f32.mrf.mxu3 }
 0x7ce   :  { %v637_v48 = vadd.f32 %v1941_v46, %v636_v47 }
 0x7cf   :  { %v535_v59 = vpop.f32.mrf.mxu1 }
 0x7d0   :  { %v644_v49 = vmul.f32 0.044715, %v637_v48  ;;  %v642_v56 = vmul.f32 0.5, %v637_v48 }
 0x7d2   :  { %v646_v50 = vmul.f32 %v644_v49, %v637_v48 }
 0x7d4   :  { %v648_v51 = vmul.f32 %v646_v50, %v637_v48 }
 0x7d6   :  { %v650_v52 = vadd.f32 %v648_v51, %v637_v48  ;;  %v1980_v48 = vld [vmem:[%s2217_s14] ss:$0 sm:$0xff] }
 0x7d8   :  { %v652_v54 = vmul.f32 0.7978846, %v650_v52 }
 0x7da   :  { %1582 = vtanh.f32 %v652_v54 }
 0x7e0   :  { %v1583_v55 = vpop.eup %1582 }
 0x7e1   :  { %v656_v57 = vadd.f32 1.0, %v1583_v55 }
 0x7e3   :  { %v658_v58 = vmul.f32 %v656_v57, %v642_v56 }
 0x7e5   :  { %1477 = vmatmul.msk.f32.vlgmr.msra.gmra.mxu0 %vm672_vm13, %v658_v58 }
 0x843   :  { %v512_v60 = vpop.f32.mrf.mxu2 }
 0x844   :  { %v536_v62 = vadd.f32 %v535_v59, %v512_v60  ;;  %v1997_v60 = vld [vmem:[%s2238_s26 + $0x1] ss:$0 sm:$0xff]  ;;  %s2239_s26 = smov 64  }
 0x846   :  { %538 = vst.msk [vmem:[#allocation2 + $0x8] sm:$0xff] %vm72_vm0, %v536_v62 }
 0x84d   :  { %v540_v63 = vld [vmem:[#allocation2 + $0x8] sm:$0xff] }
 0x84e   :  { %v546_v0 = vadd.f32 %v1869_v53, %v540_v63 }
 0x850   :  { %v548_v1 = vadd.f32 %v546_v0, %v1820_v11 }
 0x852   :  { %v554_v2 = vsel %vm72_vm0, %v548_v1, 0.0 }
 0x853   :  { %555 = vadd.xlane.f32.xlu2 %v554_v2 }
 0x862   :  { %v696_v32 = vpop.f32.mrf.mxu0 }
 0x863   :  { %v697_v4 = vadd.f32 %v1952_v3, %v696_v32 }
 0x865   :  { %v702_v5 = vadd.f32 %v697_v4, %v603_v33 }
 0x867   :  { %v706_v6 = vsel %vm72_vm0, %v702_v5, 0.0 }
 0x868   :  { %707 = vadd.xlane.f32.xlu2 %v706_v6 }
 0x8c6   :  { %v556_v7 = vpop.xlane.xlu2 %555 }
 0x8c7   :  { %v558_v53 = vmul.f32 %v556_v7, %v1739_v8 }
 0x8c9   :  { %v560_v9 = vsub.f32 %v548_v1, %v558_v53 }
 0x8cb   :  { %v562_v11 = vmul.f32 %v560_v9, %v560_v9 }
 0x8cd   :  { %v566_v10 = vsel %vm72_vm0, %v562_v11, 0.0 }
 0x8ce   :  { %567 = vadd.xlane.f32.xlu0 %v566_v10 }
 0x8db   :  { %v708_v13 = vpop.xlane.xlu2 %707 }
 0x8dc   :  { %v712_v14 = vmul.f32 %v708_v13, %v1739_v8 }
 0x8de   :  { %v714_v15 = vsub.f32 %v702_v5, %v712_v14 }
 0x8e0   :  { %v716_v61 = vmul.f32 %v714_v15, %v714_v15 }
 0x8e2   :  { %v718_v12 = vsel %vm72_vm0, %v716_v61, 0.0 }
 0x8e3   :  { %719 = vadd.xlane.f32.xlu2 %v718_v12 }
 0x941   :  { %v568_v16 = vpop.xlane.xlu0 %567 }
 0x942   :  { %v570_v17 = vmul.f32 %v568_v16, %v1739_v8 }
 0x944   :  { %v572_v18 = vadd.f32 1e-12, %v570_v17 }
 0x946   :  { %1584 = vrsqrt.f32 %v572_v18  ;;  %vm589_vm15 = vweird.f32 %v572_v18 }
 0x94c   :  { %v1585_v20 = vpop.eup %1584 }
 0x94d   :  { %v584_v21 = vmul.f32 %v1585_v20, %v572_v18  ;;  %vm590_vm14 = vweird.f32 %v1585_v20 }
 0x94e   :  { %vm591_vm1 = vmor %vm589_vm15, %vm590_vm14 }
 0x94f   :  { %v585_v23 = vmul.f32 %v1585_v20, %v584_v21 }
 0x951   :  { %v586_v26 = vmul.f32 0.5, %v585_v23 }
 0x953   :  { %v587_v28 = vsub.f32 1.5, %v586_v26 }
 0x955   :  { %v588_v29 = vmul.f32 %v1585_v20, %v587_v28 }
 0x956   :  { %v720_v31 = vpop.xlane.xlu2 %719 }
 0x957   :  { %v592_v33 = vsel %vm591_vm1, %v1585_v20, %v588_v29  ;;  %v724_v34 = vmul.f32 %v720_v31, %v1739_v8 }
 0x958   :  { %v594_v36 = vmul.f32 %v592_v33, %v560_v9 }
 0x959   :  { %v726_v37 = vadd.f32 1e-12, %v724_v34 }
 0x95a   :  { %v599_v38 = vmul.f32 %v1901_v27, %v594_v36 }
 0x95b   :  { %1586 = vrsqrt.f32 %v726_v37  ;;  %vm734_vm3 = vweird.f32 %v726_v37 }
 0x95c   :  { %v604_v39 = vadd.f32 %v1907_v30, %v599_v38  ;;  %v1985_v30 = vld [vmem:[%s2218_s15] ss:$0 sm:$0xff] }
 0x95e   :  { %1476 = vmatmul.msk.f32.gmra.mxu3 %vm72_vm0, %v604_v39 }
 0x961   :  { %v1587_v40 = vpop.eup %1586 }
 0x962   :  { %v729_v43 = vmul.f32 %v1587_v40, %v726_v37  ;;  %vm735_vm2 = vweird.f32 %v1587_v40 }
 0x963   :  { %vm736_vm4 = vmor %vm734_vm3, %vm735_vm2 }
 0x964   :  { %v730_v44 = vmul.f32 %v1587_v40, %v729_v43 }
 0x966   :  { %v731_v45 = vmul.f32 0.5, %v730_v44 }
 0x968   :  { %v732_v41 = vsub.f32 1.5, %v731_v45 }
 0x96a   :  { %v733_v47 = vmul.f32 %v1587_v40, %v732_v41 }
 0x96c   :  { %v737_v27 = vsel %vm736_vm4, %v1587_v40, %v733_v47 }
 0x96d   :  { %v748_v49 = vmul.f32 %v737_v27, %v714_v15 }
 0x96f   :  { %v753_v50 = vmul.f32 %v1980_v48, %v748_v49 }
 0x971   :  { %v1989_v51 = vadd.f32 %v1985_v30, %v753_v50 }
 0x973   :  { %1484 = vmatmul.msk.f32.vlgmr.msrb.gmra.mxu2 %vm72_vm0, %v1989_v51 }
 0x9e1   :  { %v639_v52 = vpop.f32.mrf.mxu3 }
 0x9e2   :  { %v640_v54 = vadd.f32 %v1941_v46, %v639_v52 }
 0x9e4   :  { %v645_v55 = vmul.f32 0.044715, %v640_v54  ;;  %v643_v63 = vmul.f32 0.5, %v640_v54 }
 0x9e6   :  { %v647_v56 = vmul.f32 %v645_v55, %v640_v54 }
 0x9e8   :  { %v649_v57 = vmul.f32 %v647_v56, %v640_v54 }
 0x9ea   :  { %v651_v58 = vadd.f32 %v649_v57, %v640_v54  ;;  %v1489_v57 = vld [vmem:[%s2209_s6 + $0x38] sm:$0xff] }
 0x9ec   :  { %v653_v59 = vmul.f32 0.7978846, %v651_v58  ;;  %v1488_v58 = vld [vmem:[%s2209_s6 + $0x30] sm:$0xff] }
 0x9ee   :  { %1588 = vtanh.f32 %v653_v59 }
 0x9f4   :  { %v1589_v62 = vpop.eup %1588 }
 0x9f5   :  { %v657_v0 = vadd.f32 1.0, %v1589_v62 }
 0x9f6   :  { %v793_v1 = vpop.f32.mrf.mxu2 }
 0x9f7   :  { %v2000_v2 = vadd.f32 %v1997_v60, %v793_v1  ;;  %v659_v32 = vmul.f32 %v657_v0, %v643_v63 }
 0x9f9   :  { %1478 = vmatmul.msk.f32.gmra.mxu0 %vm672_vm13, %v659_v32  ;;  %870 = vrot.lane.b32.xlu2 %v2000_v2, %s1628_s1  ;;  %v1486_v32 = vld [vmem:[%s2209_s6 + $0x20] sm:$0xff] }
 0x9fa   :  { %872 = vrot.lane.b32.xlu1 %v2000_v2, %s1625_s27 }
 0xa01   :  { %805 = vrot.lane.b32.xlu2 %v2000_v2, %s1627_s4 }
 0xa53   :  { %v871_v46 = vpop.permute.xlu2 %870 }
 0xa5b   :  { %v806_v4 = vpop.permute.xlu2 %805 }
 0xa5c   :  { %1490 = vmatpush.xpose.msk.msra.mxu1 %vm178_vm5, %v806_v4 }
 0xa5f   :  { %1491 = vmatmul.msk.f32.vlgmr.msra.gmra.mxu1 %vm178_vm5, %v2000_v2 }
 0xa6c   :  { %v873_v5 = vpop.permute.xlu1 %872 }
 0xa6d   :  { %1493 = vmatpush.xpose.msk.msrb.mxu3 %vm178_vm5, %v873_v5 }
 0xa70   :  { %1494 = vmatmul.msk.f32.vlgmr.msrb.gmra.mxu3 %vm178_vm5, %v871_v46 }
 0xa76   :  { %v699_v6 = vpop.f32.mrf.mxu0 }
 0xa77   :  { %v700_v7 = vadd.f32 %v1952_v3, %v699_v6 }
 0xa79   :  { %v703_v53 = vadd.f32 %v700_v7, %v604_v39 }
 0xa7b   :  { %v709_v9 = vsel %vm72_vm0, %v703_v53, 0.0 }
 0xa7c   :  { %710 = vadd.xlane.f32.xlu1 %v709_v9 }
 0xa95   :  { %911 = vrot.lane.b32.xlu1 %v2000_v2, %s1629_s3 }
 0xadc   :  { %v828_v25 = vpop.f32.mrf.mxu1 }
 0xadd   :  { %v831_v29 = vmul.f32 0.25, %v828_v25 }
 0xadf   :  { %v832_v37 = vadd.f32 %v831_v29, %v1800_v42 }
 0xae1   :  { %v833_v40 = vsel %vm206_vm6, %v832_v37, -inf }
 0xaef   :  { %v711_v11 = vpop.xlane.xlu1 %710 }
 0xaf0   :  { %v713_v10 = vmul.f32 %v711_v11, %v1739_v8 }
 0xaf2   :  { %v715_v13 = vsub.f32 %v703_v53, %v713_v10 }
 0xaf3   :  { %v895_v14 = vpop.f32.mrf.mxu3 }
 0xaf4   :  { %v898_v15 = vmul.f32 0.25, %v895_v14  ;;  %v717_v61 = vmul.f32 %v715_v13, %v715_v13 }
 0xaf6   :  { %v721_v12 = vsel %vm72_vm0, %v717_v61, 0.0  ;;  %v899_v16 = vadd.f32 %v898_v15, %v1800_v42 }
 0xaf7   :  { %722 = vadd.xlane.f32.xlu0 %v721_v12 }
 0xaf8   :  { %v900_v3 = vsel %vm206_vm6, %v899_v16, -inf }
 0xaf9   :  { %901 = vmax.xlane.f32.xlu2 %v900_v3 }
 0xb07   :  { %v912_v17 = vpop.permute.xlu1 %911 }
 0xb08   :  { %932 = vmatpush.msra.mxu2 %v912_v17 }
 0xb6a   :  { %v723_v18 = vpop.xlane.xlu0 %722 }
 0xb6b   :  { %v725_v19 = vmul.f32 %v723_v18, %v1739_v8 }
 0xb6c   :  { %v902_v20 = vpop.xlane.xlu2 %901 }
 0xb6d   :  { %v727_v21 = vadd.f32 1e-12, %v725_v19  ;;  %v903_v22 = vsub.f32 %v899_v16, %v902_v20  ;;  %v2076_v19 = vld [vmem:[%s2210_s7 + $0x1] ss:$0 sm:$0xff] }
 0xb6f   :  { %1590 = vrsqrt.f32 %v727_v21  ;;  %v904_v23 = vmul.f32 1.442695, %v903_v22  ;;  %vm744_vm8 = vweird.f32 %v727_v21 }
 0xb71   :  { %1592 = vpow2.f32 %v904_v23 }
 0xb75   :  { %v1591_v24 = vpop.eup %1590 }
 0xb76   :  { %v739_v26 = vmul.f32 %v1591_v24, %v727_v21  ;;  %vm745_vm7 = vweird.f32 %v1591_v24 }
 0xb77   :  { %v1593_v28 = vpop.eup %1592  ;;  %vm746_vm9 = vmor %vm744_vm8, %vm745_vm7  ;;  %vm1450_vm7 = vcmask 7168  }
 0xb78   :  { %v740_v31 = vmul.f32 %v1591_v24, %v739_v26  ;;  %v906_v33 = vsel %vm206_vm6, %v1593_v28, 0.0 }
 0xb79   :  { %907 = vadd.xlane.f32.xlu0 %v906_v33 }
 0xb7a   :  { %v741_v34 = vmul.f32 0.5, %v740_v31 }
 0xb7c   :  { %v742_v36 = vsub.f32 1.5, %v741_v34 }
 0xb7e   :  { %v743_v38 = vmul.f32 %v1591_v24, %v742_v36 }
 0xb80   :  { %v747_v39 = vsel %vm746_vm9, %v1591_v24, %v743_v38 }
 0xb81   :  { %834 = vmax.xlane.f32.xlu0 %v833_v40  ;;  %v749_v43 = vmul.f32 %v747_v39, %v715_v13 }
 0xb83   :  { %v754_v44 = vmul.f32 %v1980_v48, %v749_v43 }
 0xb85   :  { %v2028_v45 = vadd.f32 %v1985_v30, %v754_v44 }
 0xb87   :  { %1485 = vmatmul.msk.f32.gmra.mxu2 %vm72_vm0, %v2028_v45 }
 0xbec   :  { %v908_v41 = vpop.xlane.xlu0 %907 }
 0xbed   :  { %1594 = vrcp.f32 %v908_v41  ;;  %v1512_v41 = vld [vmem:[%s2213_s10 + $0x38] sm:$0xff] }
 0xbf3   :  { %v1595_v47 = vpop.eup %1594 }
 0xbf4   :  { %v910_v42 = vmul.f32 %v1595_v47, %v1593_v28  ;;  %v835_v27 = vpop.xlane.xlu0 %834  ;;  %v1511_v47 = vld [vmem:[%s2213_s10 + $0x30] sm:$0xff] }
 0xbf5   :  { %v836_v49 = vsub.f32 %v832_v37, %v835_v27  ;;  %v1509_v27 = vld [vmem:[%s2213_s10 + $0x20] sm:$0xff] }
 0xbf6   :  { %1495 = vmatmul.msk.f32.vlgmr.msra.gmra.mxu2 %vm206_vm6, %v910_v42  ;;  %v1510_v42 = vld [vmem:[%s2213_s10 + $0x28] sm:$0xff] }
 0xbf7   :  { %v837_v50 = vmul.f32 1.442695, %v836_v49 }
 0xbf9   :  { %1596 = vpow2.f32 %v837_v50 }
 0xbff   :  { %v1597_v52 = vpop.eup %1596 }
 0xc00   :  { %v839_v54 = vsel %vm206_vm6, %v1597_v52, 0.0 }
 0xc01   :  { %840 = vadd.xlane.f32.xlu0 %v839_v54 }
 0xc0a   :  { %v796_v48 = vpop.f32.mrf.mxu2 }
 0xc0b   :  { %v2035_v30 = vadd.f32 %v1997_v60, %v796_v48 }
 0xc0d   :  { %1052 = vrot.lane.b32.xlu2 %v2035_v30, %s1625_s27  ;;  %985 = vrot.lane.b32.xlu1 %v2035_v30, %s1627_s4 }
 0xc15   :  { %844 = vrot.lane.b32.xlu0 %v2000_v2, %s2239_s26  ;;  %1050 = vrot.lane.b32.xlu1 %v2035_v30, %s1628_s1  ;;  %v1487_v2 = vld [vmem:[%s2209_s6 + $0x28] sm:$0xff] }
 0xc16   :  { %977 = vmatpush.msra.mxu3 %v1487_v2 }
 0xc18   :  { %978 = vmatpush.msra.mxu3 %v1486_v32 }
 0xc67   :  { %v1053_v63 = vpop.permute.xlu2 %1052 }
 0xc74   :  { %v841_v55 = vpop.xlane.xlu0 %840 }
 0xc75   :  { %1598 = vrcp.f32 %v841_v55 }
 0xc79   :  { %v934_v0 = vpop.f32.mrf.mxu2 }
 0xc7b   :  { %v1599_v59 = vpop.eup %1598 }
 0xc7c   :  { %v843_v60 = vmul.f32 %v1599_v59, %v1597_v52  ;;  %v2105_v59 = vld [vmem:[%s2211_s8 + $0x1] ss:$0 sm:$0xff] }
 0xc7f   :  { %v986_v56 = vpop.permute.xlu1 %985 }
 0xc80   :  { %1498 = vmatpush.xpose.msk.msrb.mxu0 %vm178_vm5, %v986_v56 }
 0xc83   :  { %1499 = vmatmul.msk.f32.vlgmr.msrb.gmra.mxu0 %vm178_vm5, %v2035_v30 }
 0xc84   :  { %1134 = vmatpush.msra.mxu0 %v1489_v57 }
 0xc86   :  { %1135 = vmatpush.msra.mxu0 %v1488_v58 }
 0xc87   :  { %v845_v62 = vpop.permute.xlu0 %844  ;;  %v1051_v1 = vpop.permute.xlu1 %1050 }
 0xc88   :  { %865 = vmatpush.msrb.mxu1 %v845_v62 }
 0xc89   :  { %1492 = vmatmul.msk.f32.vlgmr.msrb.gmra.mxu1 %vm206_vm6, %v843_v60 }
 0xc8a   :  { %954 = vmatpush.msra.mxu1 %v1489_v57 }
 0xc8c   :  { %955 = vmatpush.msra.mxu1 %v1488_v58 }
 0xc8e   :  { %1501 = vmatpush.xpose.msk.msrb.mxu1 %vm178_vm5, %v1053_v63  ;;  %v2110_v63 = vld [vmem:[%s2212_s9 + $0x1] ss:$0 sm:$0xff] }
 0xc91   :  { %1496 = vmatmul.msk.f32.vlgmr.msra.gmra.mxu1 %vm178_vm5, %v934_v0 }
 0xc92   :  { %1261 = vmatpush.msra.mxu1 %v1512_v41 }
 0xc94   :  { %1262 = vmatpush.msra.mxu1 %v1511_v47 }
 0xc96   :  { %1263 = vmatpush.msra.mxu1 %v1510_v42 }
 0xc98   :  { %1264 = vmatpush.msra.mxu1 %v1509_v27 }
 0xc99   :  { %1502 = vmatmul.msk.f32.vlgmr.msrb.gmra.mxu1 %vm178_vm5, %v1051_v1 }
 0xd00   :  { %v1008_v46 = vpop.f32.mrf.mxu0 }
 0xd01   :  { %v1011_v4 = vmul.f32 0.25, %v1008_v46  ;;  %v1522_v46 = vld [vmem:[%s2215_s12 + $0x70] sm:$0xff] }
 0xd03   :  { %v1012_v5 = vadd.f32 %v1011_v4, %v1855_v35  ;;  %v1521_v4 = vld [vmem:[%s2215_s12 + $0x68] sm:$0xff] }
 0xd05   :  { %v1013_v6 = vsel %vm206_vm6, %v1012_v5, -inf }
 0xd06   :  { %v867_v7 = vpop.f32.mrf.mxu1  ;;  %1014 = vmax.xlane.f32.xlu0 %v1013_v6  ;;  %v1519_v6 = vld [vmem:[%s2215_s12 + $0x58] sm:$0xff] }
 0xd07   :  { %1497 = vmatmul.msk.f32.vlgmr.msra.gmra.mxu3 %vm178_vm5, %v867_v7  ;;  %v1518_v7 = vld [vmem:[%s2215_s12 + $0x50] sm:$0xff] }
 0xd0e   :  { %v957_v53 = vpop.f32.mrf.mxu1 }
 0xd16   :  { %v1075_v9 = vpop.f32.mrf.mxu1 }
 0xd17   :  { %v1078_v11 = vmul.f32 0.25, %v1075_v9  ;;  %v1516_v9 = vld [vmem:[%s2215_s12 + $0x40] sm:$0xff] }
 0xd19   :  { %v1079_v10 = vadd.f32 %v1078_v11, %v1855_v35  ;;  %v1551_v11 = vld [vmem:[%s2214_s11 + $0x1] ss:$0 sm:$0xff] }
 0xd1b   :  { %v1080_v13 = vsel %vm206_vm6, %v1079_v10, -inf }
 0xd1c   :  { %1081 = vmax.xlane.f32.xlu1 %v1080_v13 }
 0xd35   :  { %1024 = vrot.lane.b32.xlu1 %v2035_v30, %s2239_s26 }
 0xd79   :  { %v1015_v14 = vpop.xlane.xlu0 %1014 }
 0xd7a   :  { %v1016_v15 = vsub.f32 %v1012_v5, %v1015_v14  ;;  %v1520_v5 = vld [vmem:[%s2215_s12 + $0x60] sm:$0xff] }
 0xd7c   :  { %v1017_v61 = vmul.f32 1.442695, %v1016_v15 }
 0xd7e   :  { %1600 = vpow2.f32 %v1017_v61 }
 0xd84   :  { %v1601_v12 = vpop.eup %1600 }
 0xd85   :  { %v1019_v16 = vsel %vm206_vm6, %v1601_v12, 0.0 }
 0xd86   :  { %1020 = vadd.xlane.f32.xlu2 %v1019_v16 }
 0xd8a   :  { %v980_v3 = vpop.f32.mrf.mxu3 }
 0xd8b   :  { %v981_v17 = vadd.f32 %v980_v3, %v957_v53  ;;  %v1517_v53 = vld [vmem:[%s2215_s12 + $0x48] sm:$0xff] }
 0xd8d   :  { %983 = vst.msk [vmem:[#allocation2] sm:$0xff] %vm72_vm0, %v981_v17 }
 0xd8f   :  { %v1082_v18 = vpop.xlane.xlu1 %1081 }
 0xd90   :  { %v1083_v35 = vsub.f32 %v1079_v10, %v1082_v18 }
 0xd92   :  { %v1084_v20 = vmul.f32 1.442695, %v1083_v35 }
 0xd94   :  { %1602 = vpow2.f32 %v1084_v20  ;;  %v1164_v21 = vld [vmem:[#allocation2] sm:$0xff] }
 0xd95   :  { %v1171_v22 = vadd.f32 %v2076_v19, %v1164_v21 }
 0xd97   :  { %v1173_v23 = vadd.f32 %v1171_v22, %v1989_v51 }
 0xd99   :  { %v1179_v24 = vsel %vm72_vm0, %v1173_v23, 0.0 }
 0xd9a   :  { %v1603_v25 = vpop.eup %1602  ;;  %1180 = vadd.xlane.f32.xlu2 %v1179_v24 }
 0xd9b   :  { %v1086_v26 = vsel %vm206_vm6, %v1603_v25, 0.0 }
 0xd9c   :  { %1087 = vadd.xlane.f32.xlu0 %v1086_v26 }
 0xda7   :  { %v1025_v28 = vpop.permute.xlu1 %1024 }
 0xda8   :  { %1045 = vmatpush.msrb.mxu2 %v1025_v28 }
 0xdaa   :  { %1157 = vmatpush.msra.mxu2 %v1487_v2 }
 0xdac   :  { %1158 = vmatpush.msra.mxu2 %v1486_v32  ;;  %v1523_v32 = vld [vmem:[%s2215_s12 + $0x78] sm:$0xff] }
 0xdb0   :  { %1091 = vrot.lane.b32.xlu0 %v2035_v30, %s1629_s3 }
 0xdf9   :  { %v1021_v29 = vpop.xlane.xlu2 %1020 }
 0xdfa   :  { %1604 = vrcp.f32 %v1021_v29 }
 0xe00   :  { %v1605_v31 = vpop.eup %1604 }
 0xe01   :  { %v1023_v33 = vmul.f32 %v1605_v31, %v1601_v12 }
 0xe03   :  { %1500 = vmatmul.msk.f32.vlgmr.msrb.gmra.mxu2 %vm206_vm6, %v1023_v33 }
 0xe0d   :  { %v1181_v51 = vpop.xlane.xlu2 %1180 }
 0xe0e   :  { %v1185_v34 = vmul.f32 %v1181_v51, %v1739_v8 }
 0xe0f   :  { %v1088_v39 = vpop.xlane.xlu0 %1087 }
 0xe10   :  { %v1187_v36 = vsub.f32 %v1173_v23, %v1185_v34  ;;  %1606 = vrcp.f32 %v1088_v39 }
 0xe12   :  { %v1189_v37 = vmul.f32 %v1187_v36, %v1187_v36 }
 0xe14   :  { %v1191_v38 = vsel %vm72_vm0, %v1189_v37, 0.0 }
 0xe15   :  { %1192 = vadd.xlane.f32.xlu0 %v1191_v38 }
 0xe16   :  { %v1607_v40 = vpop.eup %1606 }
 0xe17   :  { %v1090_v43 = vmul.f32 %v1607_v40, %v1603_v25 }
 0xe22   :  { %v1092_v44 = vpop.permute.xlu0 %1091 }
 0xe23   :  { %1112 = vmatpush.msrb.mxu3 %v1092_v44 }
 0xe24   :  { %1503 = vmatmul.msk.f32.vlgmr.msrb.gmra.mxu3 %vm206_vm6, %v1090_v43 }
 0xe25   :  { %1318 = vmatpush.msra.mxu3 %v1523_v32 }
 0xe27   :  { %1319 = vmatpush.msra.mxu3 %v1522_v46 }
 0xe29   :  { %1320 = vmatpush.msra.mxu3 %v1521_v4 }
 0xe2b   :  { %1321 = vmatpush.msra.mxu3 %v1520_v5 }
 0xe2d   :  { %1322 = vmatpush.msra.mxu3 %v1519_v6 }
 0xe2f   :  { %1323 = vmatpush.msra.mxu3 %v1518_v7 }
 0xe31   :  { %1324 = vmatpush.msra.mxu3 %v1517_v53 }
 0xe33   :  { %1325 = vmatpush.msra.mxu3 %v1516_v9  ;;  %v1396_v9 = vld [vmem:[%s2219_s16 + $0x18] sm:$0xff] }
 0xe34   :  { %1419 = vmatpush.msrb.mxu0 %v1396_v9 }
 0xe86   :  { %v1047_v49 = vpop.f32.mrf.mxu2 }
 0xe87   :  { %1505 = vmatmul.msk.f32.vlgmr.msra.gmra.mxu2 %vm178_vm5, %v1047_v49 }
 0xe88   :  { %v1193_v50 = vpop.xlane.xlu0 %1192 }
 0xe89   :  { %v1197_v52 = vmul.f32 %v1193_v50, %v1739_v8 }
 0xe8b   :  { %v1199_v54 = vadd.f32 1e-12, %v1197_v52 }
 0xe8d   :  { %1608 = vrsqrt.f32 %v1199_v54  ;;  %vm1207_vm10 = vweird.f32 %v1199_v54 }
 0xe93   :  { %v1609_v48 = vpop.eup %1608 }
 0xe94   :  { %v1202_v30 = vmul.f32 %v1609_v48, %v1199_v54  ;;  %vm1208_vm6 = vweird.f32 %v1609_v48 }
 0xe95   :  { %vm1209_vm11 = vmor %vm1207_vm10, %vm1208_vm6 }
 0xe96   :  { %v1203_v55 = vmul.f32 %v1609_v48, %v1202_v30 }
 0xe98   :  { %v1204_v56 = vmul.f32 0.5, %v1203_v55 }
 0xe9a   :  { %v1205_v57 = vsub.f32 1.5, %v1204_v56 }
 0xe9c   :  { %v1206_v58 = vmul.f32 %v1609_v48, %v1205_v57 }
 0xe9e   :  { %v1210_v60 = vsel %vm1209_vm11, %v1609_v48, %v1206_v58 }
 0xe9f   :  { %v1221_v62 = vmul.f32 %v1210_v60, %v1187_v36 }
 0xea1   :  { %v1226_v0 = vmul.f32 %v2105_v59, %v1221_v62 }
 0xea3   :  { %v1231_v1 = vadd.f32 %v2110_v63, %v1226_v0 }
 0xea5   :  { %1514 = vmatmul.msk.f32.vlgmr.msra.gmra.mxu1 %vm72_vm0, %v1231_v1 }
 0xea7   :  { %v1114_v2 = vpop.f32.mrf.mxu3 }
 0xea8   :  { %1504 = vmatmul.msk.f32.vlgmr.msra.gmra.mxu0 %vm178_vm5, %v1114_v2 }
 0xf0a   :  { %v1160_v14 = vpop.f32.mrf.mxu2 }
 0xf22   :  { %v1266_v10 = vpop.f32.mrf.mxu1 }
 0xf23   :  { %v1267_v13 = vadd.f32 %v1551_v11, %v1266_v10  ;;  %v1395_v10 = vld [vmem:[%s2219_s16 + $0x10] sm:$0xff] }
 0xf24   :  { %1420 = vmatpush.msrb.mxu0 %v1395_v10 }
 0xf25   :  { %v1274_v15 = vmul.f32 0.044715, %v1267_v13  ;;  %v1137_v61 = vpop.f32.mrf.mxu0  ;;  %v1272_v24 = vmul.f32 0.5, %v1267_v13 }
 0xf26   :  { %v1161_v12 = vadd.f32 %v1160_v14, %v1137_v61  ;;  %v1394_v14 = vld [vmem:[%s2219_s16 + $0x8] sm:$0xff] }
 0xf27   :  { %v1276_v16 = vmul.f32 %v1274_v15, %v1267_v13  ;;  %v1393_v15 = vld [vmem:[%s2219_s16] sm:$0xff]  ;;  %1421 = vmatpush.msrb.mxu0 %v1394_v14 }
 0xf28   :  { %1163 = vst.msk [vmem:[#allocation2 + $0x8] sm:$0xff] %vm72_vm0, %v1161_v12 }
 0xf29   :  { %v1278_v3 = vmul.f32 %v1276_v16, %v1267_v13  ;;  %1422 = vmatpush.msrb.mxu0 %v1393_v15 }
 0xf2b   :  { %v1280_v17 = vadd.f32 %v1278_v3, %v1267_v13 }
 0xf2d   :  { %v1282_v18 = vmul.f32 0.7978846, %v1280_v17 }
 0xf2f   :  { %1610 = vtanh.f32 %v1282_v18  ;;  %v1165_v35 = vld [vmem:[#allocation2 + $0x8] sm:$0xff] }
 0xf30   :  { %v1172_v20 = vadd.f32 %v2076_v19, %v1165_v35 }
 0xf32   :  { %v1174_v21 = vadd.f32 %v1172_v20, %v2028_v45  ;;  %v1552_v45 = vld [vmem:[%s2216_s13 + $0x1] ss:$0 sm:$0xff] }
 0xf34   :  { %v1182_v22 = vsel %vm72_vm0, %v1174_v21, 0.0 }
 0xf35   :  { %v1611_v23 = vpop.eup %1610  ;;  %1183 = vadd.xlane.f32.xlu2 %v1182_v22 }
 0xf36   :  { %v1286_v25 = vadd.f32 1.0, %v1611_v23 }
 0xf38   :  { %v1288_v26 = vmul.f32 %v1286_v25, %v1272_v24  ;;  %v1553_v25 = vld [vmem:[%s2217_s14 + $0x1] ss:$0 sm:$0xff] }
 0xf3a   :  { %1525 = vmatmul.msk.f32.vlgmr.msra.gmra.mxu3 %vm672_vm13, %v1288_v26 }
 0xfa8   :  { %v1184_v28 = vpop.xlane.xlu2 %1183 }
 0xfa9   :  { %v1186_v29 = vmul.f32 %v1184_v28, %v1739_v8 }
 0xfab   :  { %v1188_v31 = vsub.f32 %v1174_v21, %v1186_v29  ;;  %v1554_v29 = vld [vmem:[%s2218_s15 + $0x1] ss:$0 sm:$0xff] }
 0xfad   :  { %v1190_v33 = vmul.f32 %v1188_v31, %v1188_v31 }
 0xfaf   :  { %v1194_v51 = vsel %vm72_vm0, %v1190_v33, 0.0 }
 0xfb0   :  { %1195 = vadd.xlane.f32.xlu1 %v1194_v51 }
 0xfbd   :  { %v1327_v19 = vpop.f32.mrf.mxu3 }
 0xfbe   :  { %v1328_v34 = vadd.f32 %v1552_v45, %v1327_v19 }
 0xfc0   :  { %v1333_v36 = vadd.f32 %v1328_v34, %v1231_v1 }
 0xfc2   :  { %v1339_v37 = vsel %vm72_vm0, %v1333_v36, 0.0 }
 0xfc3   :  { %1340 = vadd.xlane.f32.xlu2 %v1339_v37 }
0x1023   :  { %v1196_v38 = vpop.xlane.xlu1 %1195 }
0x1024   :  { %v1198_v39 = vmul.f32 %v1196_v38, %v1739_v8 }
0x1026   :  { %v1200_v40 = vadd.f32 1e-12, %v1198_v39 }
0x1028   :  { %1612 = vrsqrt.f32 %v1200_v40  ;;  %vm1217_vm12 = vweird.f32 %v1200_v40 }
0x102e   :  { %v1613_v43 = vpop.eup %1612 }
0x102f   :  { %v1212_v44 = vmul.f32 %v1613_v43, %v1200_v40  ;;  %vm1218_vm5 = vweird.f32 %v1613_v43 }
0x1030   :  { %vm1219_vm14 = vmor %vm1217_vm12, %vm1218_vm5 }
0x1031   :  { %v1213_v41 = vmul.f32 %v1613_v43, %v1212_v44 }
0x1033   :  { %v1214_v47 = vmul.f32 0.5, %v1213_v41 }
0x1035   :  { %v1215_v42 = vsub.f32 1.5, %v1214_v47 }
0x1036   :  { %v1341_v32 = vpop.xlane.xlu2 %1340 }
0x1037   :  { %v1216_v27 = vmul.f32 %v1613_v43, %v1215_v42 }
0x1039   :  { %v1220_v49 = vsel %vm1219_vm14, %v1613_v43, %v1216_v27 }
0x103a   :  { %v1222_v50 = vmul.f32 %v1220_v49, %v1188_v31  ;;  %v1556_v49 = vld [vmem:[%s2221_s18] ss:$0 sm:$0xff] }
0x103c   :  { %v1227_v52 = vmul.f32 %v2105_v59, %v1222_v50 }
0x103e   :  { %v1232_v54 = vadd.f32 %v2110_v63, %v1227_v52  ;;  %v1345_v63 = vmul.f32 %v1341_v32, %v1739_v8 }
0x1040   :  { %1515 = vmatmul.msk.f32.gmra.mxu1 %vm72_vm0, %v1232_v54  ;;  %v1347_v5 = vsub.f32 %v1333_v36, %v1345_v63 }
0x1042   :  { %v1349_v7 = vmul.f32 %v1347_v5, %v1347_v5 }
0x1044   :  { %v1351_v53 = vsel %vm72_vm0, %v1349_v7, 0.0 }
0x10bd   :  { %v1269_v48 = vpop.f32.mrf.mxu1 }
0x10be   :  { %v1270_v30 = vadd.f32 %v1551_v11, %v1269_v48  ;;  %v25_v48 = vstv %s2222_s19 }
0x10bf   :  { %26 = vst [vmem:[#allocation3] sm:$0x1] %v25_v48 }
0x10c0   :  { %v1275_v55 = vmul.f32 0.044715, %v1270_v30  ;;  %v1273_v0 = vmul.f32 0.5, %v1270_v30 }
0x10c2   :  { %v1277_v56 = vmul.f32 %v1275_v55, %v1270_v30 }
0x10c4   :  { %v1279_v57 = vmul.f32 %v1277_v56, %v1270_v30 }
0x10c6   :  { %v1281_v58 = vadd.f32 %v1279_v57, %v1270_v30 }
0x10c8   :  { %v1283_v60 = vmul.f32 0.7978846, %v1281_v58  ;;  %v1557_v58 = vld [vmem:[#allocation3] ss:$0 sm:$0xff] }
0x10ca   :  { %1614 = vtanh.f32 %v1283_v60 }
0x10d0   :  { %v1615_v62 = vpop.eup %1614 }
0x10d1   :  { %v1287_v1 = vadd.f32 1.0, %v1615_v62 }
0x10d3   :  { %v1289_v2 = vmul.f32 %v1287_v1, %v1273_v0 }
0x10d5   :  { %1526 = vmatmul.msk.f32.gmra.mxu3 %vm672_vm13, %v1289_v2 }
0x1158   :  { %v1330_v59 = vpop.f32.mrf.mxu3 }
0x1159   :  { %v1331_v46 = vadd.f32 %v1552_v45, %v1330_v59 }
0x115b   :  { %v1334_v4 = vadd.f32 %v1331_v46, %v1232_v54 }
0x115d   :  { %v1342_v6 = vsel %vm72_vm0, %v1334_v4, 0.0 }
0x115e   :  { %1343 = vadd.xlane.f32.xlu2 %v1342_v6 }
0x1166   :  { %1352 = vadd.xlane.f32.xlu2 %v1351_v53 }
0x11d1   :  { %v1344_v11 = vpop.xlane.xlu2 %1343 }
0x11d2   :  { %v1346_v13 = vmul.f32 %v1344_v11, %v1739_v8 }
0x11d4   :  { %v1348_v61 = vsub.f32 %v1334_v4, %v1346_v13 }
0x11d6   :  { %v1350_v12 = vmul.f32 %v1348_v61, %v1348_v61 }
0x11d8   :  { %v1354_v16 = vsel %vm72_vm0, %v1350_v12, 0.0 }
0x11d9   :  { %1355 = vadd.xlane.f32.xlu2 %v1354_v16  ;;  %v1353_v3 = vpop.xlane.xlu2 %1352 }
0x11da   :  { %v1357_v17 = vmul.f32 %v1353_v3, %v1739_v8 }
0x11dc   :  { %v1359_v18 = vadd.f32 1e-12, %v1357_v17 }
0x11de   :  { %1616 = vrsqrt.f32 %v1359_v18  ;;  %vm1367_vm15 = vweird.f32 %v1359_v18 }
0x11e4   :  { %v1617_v35 = vpop.eup %1616 }
0x11e5   :  { %v1362_v20 = vmul.f32 %v1617_v35, %v1359_v18  ;;  %vm1368_vm13 = vweird.f32 %v1617_v35 }
0x11e6   :  { %vm1369_vm1 = vmor %vm1367_vm15, %vm1368_vm13 }
0x11e7   :  { %v1363_v21 = vmul.f32 %v1617_v35, %v1362_v20 }
0x11e9   :  { %v1364_v22 = vmul.f32 0.5, %v1363_v21 }
0x11eb   :  { %v1365_v23 = vsub.f32 1.5, %v1364_v22 }
0x11ed   :  { %v1366_v24 = vmul.f32 %v1617_v35, %v1365_v23 }
0x11ef   :  { %v1370_v26 = vsel %vm1369_vm1, %v1617_v35, %v1366_v24 }
0x11f0   :  { %v1381_v28 = vmul.f32 %v1370_v26, %v1347_v5 }
0x11f2   :  { %v1386_v31 = vmul.f32 %v1553_v25, %v1381_v28 }
0x11f4   :  { %v1391_v33 = vadd.f32 %v1554_v29, %v1386_v31 }
0x11f6   :  { %1529 = vmatmul.msk.f32.vlgmr.msrb.gmra.mxu0 %vm72_vm0, %v1391_v33 }
0x124c   :  { %v1356_v51 = vpop.xlane.xlu2 %1355 }
0x124d   :  { %v1358_v45 = vmul.f32 %v1356_v51, %v1739_v8  ;;  %v1555_v8 = vld [vmem:[%s2220_s17] ss:$0 sm:$0xff] }
0x124f   :  { %v1360_v19 = vadd.f32 1e-12, %v1358_v45 }
0x1251   :  { %1618 = vrsqrt.f32 %v1360_v19  ;;  %vm1377_vm3 = vweird.f32 %v1360_v19 }
0x1257   :  { %v1619_v34 = vpop.eup %1618 }
0x1258   :  { %v1372_v36 = vmul.f32 %v1619_v34, %v1360_v19  ;;  %vm1378_vm2 = vweird.f32 %v1619_v34 }
0x1259   :  { %vm1379_vm4 = vmor %vm1377_vm3, %vm1378_vm2 }
0x125a   :  { %v1373_v37 = vmul.f32 %v1619_v34, %v1372_v36 }
0x125c   :  { %v1374_v38 = vmul.f32 0.5, %v1373_v37 }
0x125e   :  { %v1375_v39 = vsub.f32 1.5, %v1374_v38 }
0x1260   :  { %v1376_v40 = vmul.f32 %v1619_v34, %v1375_v39 }
0x1262   :  { %v1380_v43 = vsel %vm1379_vm4, %v1619_v34, %v1376_v40 }
0x1263   :  { %v1382_v44 = vmul.f32 %v1380_v43, %v1348_v61 }
0x1265   :  { %v1387_v41 = vmul.f32 %v1553_v25, %v1382_v44 }
0x1267   :  { %v1392_v47 = vadd.f32 %v1554_v29, %v1387_v41 }
0x1269   :  { %1530 = vmatmul.msk.f32.gmra.mxu0 %vm72_vm0, %v1392_v47 }
0x1273   :  { %v1424_v42 = vpop.f32.mrf.mxu0 }
0x1274   :  { %v1425_v27 = vadd.f32 %v1555_v8, %v1424_v42 }
0x1276   :  { %1620 = vtanh.f32 %v1425_v27 }
0x127c   :  { %v1621_v50 = vpop.eup %1620 }
0x127d   :  { %v1436_v52 = vmul.f32 %v1621_v50, %v1556_v49 }
0x127f   :  { %v1438_v54 = vsel %vm72_vm0, %v1436_v52, 0.0 }
0x1280   :  { %1439 = vadd.xlane.f32.xlu2 %v1438_v54 }
0x12e6   :  { %v1427_v30 = vpop.f32.mrf.mxu0 }
0x12e7   :  { %v1428_v55 = vadd.f32 %v1555_v8, %v1427_v30 }
0x12e9   :  { %1622 = vtanh.f32 %v1428_v55 }
0x12ef   :  { %v1623_v56 = vpop.eup %1622 }
0x12f0   :  { %v1437_v57 = vmul.f32 %v1623_v56, %v1556_v49 }
0x12f2   :  { %v1441_v60 = vsel %vm72_vm0, %v1437_v57, 0.0 }
0x12f3   :  { %1442 = vadd.xlane.f32.xlu2 %v1441_v60  ;;  %v1440_v62 = vpop.xlane.xlu2 %1439 }
0x12f4   :  { %v1448_v0 = vadd.f32 %v1557_v58, %v1440_v62 }
0x12f6   :  { %1451 = vst.msk [vmem:[%s2223_s20] sm:$0xff] %vm1450_vm7, %v1448_v0 }
0x1366   :  { %v1443_v1 = vpop.xlane.xlu2 %1442 }
0x1367   :  { %v1449_v2 = vadd.f32 %v1557_v58, %v1443_v1 }
0x1369   :  { %1452 = vst.msk [vmem:[%s2223_s20 + $0x8] sm:$0xff] %vm1450_vm7, %v1449_v2 }

</bundles_post_ra>
